<compile_context>
chip_gen: v6e
topology: v6e:2x2x1
jax: 0.10.0
libtpu: 0.0.40
codegen_flags: <defaults>
</compile_context>

<pallas_src>
import math
from functools import partial

import jax
import jax.numpy as jnp
from jax.experimental import pallas as pl
from jax.experimental.pallas import tpu as pltpu

LN_EPS = 1e-12


def _tpu_generation():
    try:
        kind = jax.devices()[0].device_kind.lower()
    except Exception:
        return 6
    for tok in ("v7", "v6", "v5", "v4", "v3", "v2"):
        if tok in kind:
            return int(tok[1])
    return 6


TPU_GEN = _tpu_generation()
# Generation-aware scoped-VMEM limit: v5e/v6e have 128 MiB physical, v7x 64 MiB.
if TPU_GEN >= 7:
    VMEM_LIMIT = 48 * 1024 * 1024
elif TPU_GEN in (5, 6):
    VMEM_LIMIT = 96 * 1024 * 1024
else:
    VMEM_LIMIT = 32 * 1024 * 1024
BF16_EXP = TPU_GEN >= 6          # v6e/v7x EUP supports bf16 exp; v5e does not
LANE_TARGET = 256 if TPU_GEN >= 6 else 128   # MXU width / lane-dense target


def _tile(dim, target, mult):
    """Largest multiple of `mult` that divides `dim` and is <= target, else dim."""
    if dim <= target:
        return dim
    t = (target // mult) * mult
    while t >= mult:
        if dim % t == 0:
            return t
        t -= mult
    return dim


def choose_head_group(num_heads, head_dim, lane_target):
    """Heads fused per grid step so g*head_dim approaches the MXU width."""
    g = max(1, min(num_heads, lane_target // max(1, head_dim)))
    while num_heads % g:
        g -= 1
    return g


# --------------------------- tiled matmul (+gelu) ---------------------------

def _matmul_kernel(x_ref, w_ref, b_ref, o_ref, acc_ref, *, activation):
    kk = pl.program_id(2)

    @pl.when(kk == 0)
    def _():
        acc_ref[...] = jnp.zeros_like(acc_ref)

    acc_ref[...] += jnp.dot(x_ref[...], w_ref[...],
                            preferred_element_type=jnp.float32)

    @pl.when(kk == pl.num_programs(2) - 1)
    def _():
        y = acc_ref[...] + b_ref[...]
        if activation == "gelu":
            y = jax.nn.gelu(y, approximate=True)
        o_ref[...] = y.astype(o_ref.dtype)


def pallas_matmul(x, w, b, activation=None, out_dtype=jnp.bfloat16,
                  tm=1024, tn=1024, tk=512):
    M, K = x.shape
    N = w.shape[1]
    tm = _tile(M, tm, 8)
    tn = _tile(N, tn, 128)
    tk = _tile(K, tk, 128)
    return pl.pallas_call(
        partial(_matmul_kernel, activation=activation),
        out_shape=jax.ShapeDtypeStruct((M, N), out_dtype),
        grid=(M // tm, N // tn, K // tk),
        in_specs=[
            pl.BlockSpec((tm, tk), lambda i, j, k: (i, k)),
            pl.BlockSpec((tk, tn), lambda i, j, k: (k, j)),
            pl.BlockSpec((1, tn), lambda i, j, k: (0, j)),
        ],
        out_specs=pl.BlockSpec((tm, tn), lambda i, j, k: (i, j)),
        scratch_shapes=[pltpu.VMEM((tm, tn), jnp.float32)],
        compiler_params=pltpu.CompilerParams(
            dimension_semantics=("parallel", "parallel", "arbitrary"),
            vmem_limit_bytes=VMEM_LIMIT),
    )(x, w, b.reshape(1, N))


# ---------------- tiled matmul fused with residual-add + LayerNorm ----------

def _matmul_res_ln_kernel(x_ref, w_ref, b_ref, res_ref, g_ref, bt_ref,
                          o_ref, acc_ref, *, eps):
    kk = pl.program_id(1)

    @pl.when(kk == 0)
    def _():
        acc_ref[...] = jnp.zeros_like(acc_ref)

    acc_ref[...] += jnp.dot(x_ref[...], w_ref[...],
                            preferred_element_type=jnp.float32)

    @pl.when(kk == pl.num_programs(1) - 1)
    def _():
        y = acc_ref[...] + b_ref[...] + res_ref[...].astype(jnp.float32)
        mu = jnp.mean(y, axis=-1, keepdims=True)
        var = jnp.mean((y - mu) ** 2, axis=-1, keepdims=True)
        o_ref[...] = ((y - mu) * jax.lax.rsqrt(var + eps) * g_ref[...]
                      + bt_ref[...]).astype(o_ref.dtype)


def pallas_matmul_res_ln(x, w, b, res, gamma, beta, tm=1024, tk=512):
    """(x @ w + b + res) -> LayerNorm, with N kept as the full hidden dim."""
    M, K = x.shape
    N = w.shape[1]
    tm = _tile(M, tm, 8)
    tk = _tile(K, tk, 128)
    return pl.pallas_call(
        partial(_matmul_res_ln_kernel, eps=LN_EPS),
        out_shape=jax.ShapeDtypeStruct((M, N), jnp.bfloat16),
        grid=(M // tm, K // tk),
        in_specs=[
            pl.BlockSpec((tm, tk), lambda i, k: (i, k)),
            pl.BlockSpec((tk, N), lambda i, k: (k, 0)),
            pl.BlockSpec((1, N), lambda i, k: (0, 0)),
            pl.BlockSpec((tm, N), lambda i, k: (i, 0)),
            pl.BlockSpec((1, N), lambda i, k: (0, 0)),
            pl.BlockSpec((1, N), lambda i, k: (0, 0)),
        ],
        out_specs=pl.BlockSpec((tm, N), lambda i, k: (i, 0)),
        scratch_shapes=[pltpu.VMEM((tm, N), jnp.float32)],
        compiler_params=pltpu.CompilerParams(
            dimension_semantics=("parallel", "arbitrary"),
            vmem_limit_bytes=VMEM_LIMIT),
    )(x, w, b.reshape(1, N), res, gamma.reshape(1, N), beta.reshape(1, N))


# --------------------------- embeddings LayerNorm ---------------------------

def _layernorm_kernel(x_ref, g_ref, b_ref, o_ref, *, eps):
    x = x_ref[...].astype(jnp.float32)
    mu = jnp.mean(x, axis=-1, keepdims=True)
    var = jnp.mean((x - mu) ** 2, axis=-1, keepdims=True)
    o_ref[...] = ((x - mu) * jax.lax.rsqrt(var + eps) * g_ref[...]
                  + b_ref[...]).astype(o_ref.dtype)


def pallas_layernorm(x, gamma, beta, tm=1024):
    M, H = x.shape
    tm = _tile(M, tm, 8)
    return pl.pallas_call(
        partial(_layernorm_kernel, eps=LN_EPS),
        out_shape=jax.ShapeDtypeStruct((M, H), jnp.bfloat16),
        grid=(M // tm,),
        in_specs=[
            pl.BlockSpec((tm, H), lambda i: (i, 0)),
            pl.BlockSpec((1, H), lambda i: (0, 0)),
            pl.BlockSpec((1, H), lambda i: (0, 0)),
        ],
        out_specs=pl.BlockSpec((tm, H), lambda i: (i, 0)),
        compiler_params=pltpu.CompilerParams(
            dimension_semantics=("parallel",),
            vmem_limit_bytes=VMEM_LIMIT),
    )(x, gamma.reshape(1, H), beta.reshape(1, H))


# ------ fused Q/K/V projection: grouped heads, weights resident per group ---

def _qkv_kernel(x_ref, wq_ref, wk_ref, wv_ref, bq_ref, bk_ref, bv_ref,
                q_ref, k_ref, v_ref, *, scale):
    x = x_ref[...]                                           # (S, H) bf16
    q = jnp.dot(x, wq_ref[0], preferred_element_type=jnp.float32) + bq_ref[0]
    q_ref[0, 0] = (q * scale).astype(q_ref.dtype)            # fold 1/sqrt(hd)
    k = jnp.dot(x, wk_ref[0], preferred_element_type=jnp.float32) + bk_ref[0]
    k_ref[0, 0] = k.astype(k_ref.dtype)
    v = jnp.dot(x, wv_ref[0], preferred_element_type=jnp.float32) + bv_ref[0]
    v_ref[0, 0] = v.astype(v_ref.dtype)


def pallas_qkv_proj(h, wq, wk, wv, bq, bk, bv, *, batch, seq, head_dim):
    """Outputs are head-GROUP major: (B, G, S, g*hd), g*hd lane-dense."""
    M, H = h.shape
    G, _, ghd = wq.shape
    scale = 1.0 / math.sqrt(head_dim)
    out_sd = jax.ShapeDtypeStruct((batch, G, seq, ghd), jnp.bfloat16)
    head_out = pl.BlockSpec((1, 1, seq, ghd), lambda g, b: (b, g, 0, 0))
    w_spec = pl.BlockSpec((1, H, ghd), lambda g, b: (g, 0, 0))
    b_spec = pl.BlockSpec((1, 1, ghd), lambda g, b: (g, 0, 0))
    # Head-group OUTER / batch inner: weight block index is constant along the
    # inner loop, so the 3 projection weights are DMA'd once per group instead
    # of once per batch element.
    return pl.pallas_call(
        partial(_qkv_kernel, scale=scale),
        out_shape=(out_sd, out_sd, out_sd),
        grid=(G, batch),
        in_specs=[
            pl.BlockSpec((seq, H), lambda g, b: (b, 0)),   # rows of batch b
            w_spec, w_spec, w_spec,
            b_spec, b_spec, b_spec,
        ],
        out_specs=(head_out, head_out, head_out),
        compiler_params=pltpu.CompilerParams(
            dimension_semantics=("parallel", "parallel"),
            vmem_limit_bytes=VMEM_LIMIT),
    )(h, wq, wk, wv, bq, bk, bv)


# ------------------------------- attention ----------------------------------

def _attention_kernel(q_ref, k_ref, v_ref, o_ref, *, heads_per_group, head_dim,
                      bf16_exp):
    q = q_ref[0, 0]                         # (S, g*hd) bf16, pre-scaled
    k = k_ref[0, 0]
    v = v_ref[0, 0]
    outs = []
    for hh in range(heads_per_group):
        sl = slice(hh * head_dim, (hh + 1) * head_dim)
        s = jax.lax.dot_general(q[:, sl], k[:, sl], (((1,), (1,)), ((), ())),
                                preferred_element_type=jnp.float32)   # (S, S)
        m = jnp.max(s, axis=-1, keepdims=True)
        e = s - m
        # bf16 exp on v6e/v7x (EUP slot is the binding unit here); f32 on v5e.
        p = jnp.exp(e.astype(jnp.bfloat16)) if bf16_exp else jnp.exp(e)
        denom = jnp.sum(p.astype(jnp.float32), axis=-1, keepdims=True)
        ctx = jnp.dot(p.astype(v.dtype), v[:, sl],
                      preferred_element_type=jnp.float32)
        # fold softmax normalization into the (S, hd) output, not (S, S) probs
        outs.append(ctx * pl.reciprocal(denom, approx=True))
    o_ref[0, 0] = jnp.concatenate(outs, axis=-1).astype(o_ref.dtype)


def pallas_attention(q, k, v, *, head_dim):
    # Full S x S scores per head; fine for BERT-length sequences.
    # TODO(synk): flash-style K/V tiling for long sequences (S x S f32
    #             temporaries would blow past VMEM on v7x at S >= ~2048).
    B, G, S, ghd = q.shape
    assert S <= 1024, "add flash-style K/V tiling for longer sequences"
    heads_per_group = ghd // head_dim
    blk = pl.BlockSpec((1, 1, S, ghd), lambda b, g: (b, g, 0, 0))
    return pl.pallas_call(
        partial(_attention_kernel, heads_per_group=heads_per_group,
                head_dim=head_dim, bf16_exp=BF16_EXP),
        out_shape=jax.ShapeDtypeStruct((B, G, S, ghd), jnp.bfloat16),
        grid=(B, G),
        in_specs=[blk, blk, blk],
        out_specs=blk,
        compiler_params=pltpu.CompilerParams(
            dimension_semantics=("parallel", "parallel"),
            vmem_limit_bytes=VMEM_LIMIT),
    )(q, k, v)


# --- attention output projection (per head-GROUP reduction, K=g*hd) + res+LN -

def _attn_out_res_ln_kernel(ctx_ref, wo_ref, bo_ref, res_ref, g_ref, bt_ref,
                            o_ref, acc_ref, *, eps):
    gg = pl.program_id(1)

    @pl.when(gg == 0)
    def _():
        acc_ref[...] = jnp.zeros_like(acc_ref)

    acc_ref[...] += jnp.dot(ctx_ref[0, 0], wo_ref[0],
                            preferred_element_type=jnp.float32)

    @pl.when(gg == pl.num_programs(1) - 1)
    def _():
        y = acc_ref[...] + bo_ref[...] + res_ref[...].astype(jnp.float32)
        mu = jnp.mean(y, axis=-1, keepdims=True)
        var = jnp.mean((y - mu) ** 2, axis=-1, keepdims=True)
        o_ref[...] = ((y - mu) * jax.lax.rsqrt(var + eps) * g_ref[...]
                      + bt_ref[...]).astype(o_ref.dtype)


def pallas_attn_out_res_ln(ctx, wo, bo, res, gamma, beta):
    B, G, S, ghd = ctx.shape
    H = wo.shape[2]
    return pl.pallas_call(
        partial(_attn_out_res_ln_kernel, eps=LN_EPS),
        out_shape=jax.ShapeDtypeStruct((B * S, H), jnp.bfloat16),
        grid=(B, G),
        in_specs=[
            pl.BlockSpec((1, 1, S, ghd), lambda b, g: (b, g, 0, 0)),
            pl.BlockSpec((1, ghd, H), lambda b, g: (g, 0, 0)),
            pl.BlockSpec((1, H), lambda b, g: (0, 0)),
            pl.BlockSpec((S, H), lambda b, g: (b, 0)),
            pl.BlockSpec((1, H), lambda b, g: (0, 0)),
            pl.BlockSpec((1, H), lambda b, g: (0, 0)),
        ],
        out_specs=pl.BlockSpec((S, H), lambda b, g: (b, 0)),
        scratch_shapes=[pltpu.VMEM((S, H), jnp.float32)],
        compiler_params=pltpu.CompilerParams(
            dimension_semantics=("parallel", "arbitrary"),
            vmem_limit_bytes=VMEM_LIMIT),
    )(ctx, wo, bo.reshape(1, H), res, gamma.reshape(1, H), beta.reshape(1, H))


# ------------- fused classifier + masked cross-entropy (training) -----------

def _classify_ce_kernel(h_ref, w_ref, b_ref, tgt_ref, loss_ref,
                        tot_ref, cnt_ref, *, ignore_index):
    i = pl.program_id(0)

    @pl.when(i == 0)
    def _():
        tot_ref[...] = jnp.zeros_like(tot_ref)
        cnt_ref[...] = jnp.zeros_like(cnt_ref)

    # class dim is padded to 128 with bias = -1e30 -> padded cols vanish below
    logits = jnp.dot(h_ref[...], w_ref[...],
                     preferred_element_type=jnp.float32) + b_ref[...]
    tgt = tgt_ref[...]                                        # (tm, 1) i32
    m = jnp.max(logits, axis=-1, keepdims=True)
    lse = jnp.log(jnp.sum(jnp.exp(logits - m), axis=-1, keepdims=True)) + m
    col = jax.lax.broadcasted_iota(jnp.int32, logits.shape, 1)
    tgt_logit = jnp.sum(jnp.where(col == tgt, logits, 0.0),
                        axis=-1, keepdims=True)
    valid = (tgt != ignore_index).astype(jnp.float32)
    tot_ref[...] += jnp.sum((lse - tgt_logit) * valid, keepdims=True)
    cnt_ref[...] += jnp.sum(valid, keepdims=True)

    @pl.when(i == pl.num_programs(0) - 1)
    def _():
        # Exact divide (scalar, costs nothing; avoids approx-reciprocal bias).
        # NOTE: if every target == ignore_index this yields inf/nan (PyTorch
        # returns nan in that case too).
        loss_ref[...] = tot_ref[...] / cnt_ref[...]


def pallas_classify_ce(h, w_pad, b_pad, targets, ignore_index, tm=1024):
    # TODO(synk): on v7x (2 TCs) split the grid with per-core partial sums; a
    #             single sequential grid leaves one core idle (kernel is tiny).
    M, H = h.shape
    Cp = w_pad.shape[1]
    tm = _tile(M, tm, 8)
    tgt = targets.reshape(M, 1).astype(jnp.int32)
    out = pl.pallas_call(
        partial(_classify_ce_kernel, ignore_index=ignore_index),
        out_shape=jax.ShapeDtypeStruct((1, 1), jnp.float32),
        grid=(M // tm,),
        in_specs=[
            pl.BlockSpec((tm, H), lambda i: (i, 0)),
            pl.BlockSpec((H, Cp), lambda i: (0, 0)),
            pl.BlockSpec((1, Cp), lambda i: (0, 0)),
            pl.BlockSpec((tm, 1), lambda i: (i, 0)),
        ],
        out_specs=pl.BlockSpec((1, 1), lambda i: (0, 0)),
        scratch_shapes=[pltpu.VMEM((1, 1), jnp.float32),
                        pltpu.VMEM((1, 1), jnp.float32)],
        compiler_params=pltpu.CompilerParams(
            dimension_semantics=("arbitrary",),
            vmem_limit_bytes=VMEM_LIMIT),
    )(h, w_pad, b_pad.reshape(1, Cp), tgt)
    return out[0, 0]


def pallas_classifier_logits(h, w_pad, b_pad, class_num):
    """Inference: weights already padded to 128 classes in init_params."""
    logits = pallas_matmul(h, w_pad, b_pad, activation=None,
                           out_dtype=jnp.float32)
    return logits[:, :class_num]


# ------------------------- parameters / model glue --------------------------

def init_params(key, *, vocab_size, hidden, layers, num_heads, intermediate,
                max_pos, type_vocab, class_num, head_group):
    hd = hidden // num_heads
    G = num_heads // head_group
    ghd = head_group * hd
    Cp = ((class_num + 127) // 128) * 128

    def normal(k, shape, dtype=jnp.float32):
        return (0.02 * jax.random.normal(k, shape, jnp.float32)).astype(dtype)

    keys = iter(jax.random.split(key, 8 + layers * 16))
    cls_w = jnp.pad(normal(next(keys), (hidden, class_num)),
                    ((0, 0), (0, Cp - class_num))).astype(jnp.bfloat16)
    cls_b = jnp.concatenate([jnp.zeros((class_num,), jnp.float32),
                             jnp.full((Cp - class_num,), -1e30, jnp.float32)])
    p = {
        "word_emb": normal(next(keys), (vocab_size, hidden)),
        "pos_emb": normal(next(keys), (max_pos, hidden)),
        "type_emb": normal(next(keys), (type_vocab, hidden)),
        "emb_ln_g": jnp.ones((hidden,), jnp.float32),
        "emb_ln_b": jnp.zeros((hidden,), jnp.float32),
        "layers": [],
        # class dim pre-padded to a lane-dense 128 (padded bias = -1e30)
        "cls_w": cls_w,
        "cls_b": cls_b,
    }
    for _ in range(layers):
        lp = {
            # head-GROUP major layouts so the head split is pure BlockSpec
            # addressing with lane-dense (g*hd) last dims
            "q_w": normal(next(keys), (G, hidden, ghd), jnp.bfloat16),
            "q_b": jnp.zeros((G, 1, ghd), jnp.float32),
            "k_w": normal(next(keys), (G, hidden, ghd), jnp.bfloat16),
            "k_b": jnp.zeros((G, 1, ghd), jnp.float32),
            "v_w": normal(next(keys), (G, hidden, ghd), jnp.bfloat16),
            "v_b": jnp.zeros((G, 1, ghd), jnp.float32),
            "ao_w": normal(next(keys), (G, ghd, hidden), jnp.bfloat16),
            "ao_b": jnp.zeros((hidden,), jnp.float32),
            "ln1_g": jnp.ones((hidden,), jnp.float32),
            "ln1_b": jnp.zeros((hidden,), jnp.float32),
            "ff1_w": normal(next(keys), (hidden, intermediate), jnp.bfloat16),
            "ff1_b": jnp.zeros((intermediate,), jnp.float32),
            "ff2_w": normal(next(keys), (intermediate, hidden), jnp.bfloat16),
            "ff2_b": jnp.zeros((hidden,), jnp.float32),
            "ln2_g": jnp.ones((hidden,), jnp.float32),
            "ln2_b": jnp.zeros((hidden,), jnp.float32),
        }
        p["layers"].append(lp)
    return p


def punctuation_model_forward(params, x, target=None, *, num_heads, class_num,
                              ignore_index):
    """Equivalent of PunctuationModel.forward(x, target)."""
    B, S = x.shape
    H = params["word_emb"].shape[1]
    hd = H // num_heads

    # --- BERT embeddings (gathers / adds are plain-JAX glue, LN is Pallas) ---
    emb = (jnp.take(params["word_emb"], x, axis=0)
           + params["pos_emb"][:S][None, :, :]
           + params["type_emb"][0][None, None, :])
    h = pallas_layernorm(emb.reshape(B * S, H),
                         params["emb_ln_g"], params["emb_ln_b"])   # bf16

    # --- BERT transformer layers ---
    for lp in params["layers"]:
        q, k, v = pallas_qkv_proj(h, lp["q_w"], lp["k_w"], lp["v_w"],
                                  lp["q_b"], lp["k_b"], lp["v_b"],
                                  batch=B, seq=S, head_dim=hd)   # (B,G,S,g*hd)
        ctx = pallas_attention(q, k, v, head_dim=hd)
        h = pallas_attn_out_res_ln(ctx, lp["ao_w"], lp["ao_b"],
                                   h, lp["ln1_g"], lp["ln1_b"])    # (B*S, H)
        ff = pallas_matmul(h, lp["ff1_w"], lp["ff1_b"], activation="gelu")
        h = pallas_matmul_res_ln(ff, lp["ff2_w"], lp["ff2_b"],
                                 h, lp["ln2_g"], lp["ln2_b"])

    # --- classifier head: nn.Linear(hidden_size, class_num) ---
    if target is not None:
        # predict.view(-1, C), target.view(-1), CE with ignore_index
        return pallas_classify_ce(h, params["cls_w"], params["cls_b"],
                                  target.reshape(-1), ignore_index)
    logits = pallas_classifier_logits(h, params["cls_w"], params["cls_b"],
                                      class_num)
    return logits.reshape(B, S, class_num)


if __name__ == "__main__":
    B, S = 2, 8
    hidden, num_layers, num_heads, intermediate = 32, 2, 2, 64
    vocab, max_pos, type_vocab = 64, 16, 2
    class_num, padding = 4, -1  # padding == CrossEntropyLoss ignore_index

    head_dim = hidden // num_heads
    head_group = choose_head_group(num_heads, head_dim, LANE_TARGET)

    key = jax.random.PRNGKey(0)
    kp, kx, kt, km = jax.random.split(key, 4)
    params = init_params(kp, vocab_size=vocab, hidden=hidden, layers=num_layers,
                         num_heads=num_heads, intermediate=intermediate,
                         max_pos=max_pos, type_vocab=type_vocab,
                         class_num=class_num, head_group=head_group)

    x = jax.random.randint(kx, (B, S), 1, vocab, dtype=jnp.int32)
    target = jax.random.randint(kt, (B, S), 0, class_num, dtype=jnp.int32)
    pad_mask = jax.random.bernoulli(km, 0.2, (B, S))
    target = jnp.where(pad_mask, padding, target)

    fwd = jax.jit(partial(punctuation_model_forward,
                          num_heads=num_heads, class_num=class_num,
                          ignore_index=padding))

    # inference path (target is None) -> per-token logits
    predict = fwd(params, x)
    # training path (target given) -> scalar masked cross-entropy loss
    loss = fwd(params, x, target)

    jax.block_until_ready((predict, loss))
    assert predict.shape == (B, S, class_num)
    assert loss.shape == ()
    print("KERNEL_OK")
</pallas_src>

<mosaic_0001>
module attributes {stable_mosaic.version = 11 : i64} {
  func.func @_qkv_kernel(%arg0: i32, %arg1: i32, %arg2: memref<8x32xbf16, #tpu.memory_space<vmem>>, %arg3: memref<1x32x32xbf16, #tpu.memory_space<vmem>>, %arg4: memref<1x32x32xbf16, #tpu.memory_space<vmem>>, %arg5: memref<1x32x32xbf16, #tpu.memory_space<vmem>>, %arg6: memref<1x1x32xf32, #tpu.memory_space<vmem>>, %arg7: memref<1x1x32xf32, #tpu.memory_space<vmem>>, %arg8: memref<1x1x32xf32, #tpu.memory_space<vmem>>, %arg9: memref<1x1x8x32xbf16, #tpu.memory_space<vmem>>, %arg10: memref<1x1x8x32xbf16, #tpu.memory_space<vmem>>, %arg11: memref<1x1x8x32xbf16, #tpu.memory_space<vmem>>) attributes {dimension_semantics = [#tpu.dimension_semantics<parallel>, #tpu.dimension_semantics<parallel>], iteration_bounds = array<i64: 1, 2>, scalar_prefetch = 0 : i64, scratch_operands = 0 : i64, tpu.core_type = #tpu.core_type<tc>, window_params = [{transform_indices = @transform_0, window_bounds = array<i64: 8, 32>}, {transform_indices = @transform_1, window_bounds = array<i64: 1, 32, 32>}, {transform_indices = @transform_2, window_bounds = array<i64: 1, 32, 32>}, {transform_indices = @transform_3, window_bounds = array<i64: 1, 32, 32>}, {transform_indices = @transform_4, window_bounds = array<i64: 1, 1, 32>}, {transform_indices = @transform_5, window_bounds = array<i64: 1, 1, 32>}, {transform_indices = @transform_6, window_bounds = array<i64: 1, 1, 32>}, {transform_indices = @transform_7, window_bounds = array<i64: 1, 1, 8, 32>}, {transform_indices = @transform_8, window_bounds = array<i64: 1, 1, 8, 32>}, {transform_indices = @transform_9, window_bounds = array<i64: 1, 1, 8, 32>}]} {
    %c0 = arith.constant 0 : index
    %c0_0 = arith.constant 0 : index
    %0 = vector.load %arg2[%c0, %c0_0] : memref<8x32xbf16, #tpu.memory_space<vmem>>, vector<8x32xbf16>
    %c0_1 = arith.constant 0 : index
    %c0_2 = arith.constant 0 : index
    %c0_3 = arith.constant 0 : index
    %1 = vector.load %arg3[%c0_1, %c0_2, %c0_3] : memref<1x32x32xbf16, #tpu.memory_space<vmem>>, vector<1x32x32xbf16>
    %2 = vector.shape_cast %1 : vector<1x32x32xbf16> to vector<32x32xbf16>
    %cst = arith.constant dense<0.000000e+00> : vector<8x32xf32>
    %3 = tpu.matmul %0, %2, %cst {dimension_numbers = #tpu.dot_dimension_numbers<[1], [0], [0], [1], [0, 0, 1, 1], [], []>} : vector<8x32xbf16>, vector<32x32xbf16>, vector<8x32xf32> -> vector<8x32xf32>
    %c0_4 = arith.constant 0 : index
    %c0_5 = arith.constant 0 : index
    %c0_6 = arith.constant 0 : index
    %4 = vector.load %arg6[%c0_4, %c0_5, %c0_6] : memref<1x1x32xf32, #tpu.memory_space<vmem>>, vector<1x1x32xf32>
    %5 = vector.shape_cast %4 : vector<1x1x32xf32> to vector<1x32xf32>
    %6 = vector.broadcast %5 : vector<1x32xf32> to vector<8x32xf32>
    %7 = arith.addf %3, %6 : vector<8x32xf32>
    %cst_7 = arith.constant 2.500000e-01 : f32
    %8 = vector.broadcast %cst_7 : f32 to vector<8x32xf32>
    %9 = arith.mulf %7, %8 : vector<8x32xf32>
    %10 = arith.truncf %9 : vector<8x32xf32> to vector<8x32xbf16>
    %c0_8 = arith.constant 0 : index
    %c0_9 = arith.constant 0 : index
    %c0_10 = arith.constant 0 : index
    %c0_11 = arith.constant 0 : index
    %11 = vector.load %arg9[%c0_8, %c0_9, %c0_10, %c0_11] : memref<1x1x8x32xbf16, #tpu.memory_space<vmem>>, vector<1x1x8x32xbf16>
    %12 = vector.shape_cast %11 : vector<1x1x8x32xbf16> to vector<8x32xbf16>
    %13 = vector.shape_cast %10 : vector<8x32xbf16> to vector<1x1x8x32xbf16>
    tpu.vector_store %arg9[%c0_8, %c0_9, %c0_10, %c0_11], %13 {strides = array<i32>} : memref<1x1x8x32xbf16, #tpu.memory_space<vmem>>, vector<1x1x8x32xbf16>,
    %c0_12 = arith.constant 0 : index
    %c0_13 = arith.constant 0 : index
    %c0_14 = arith.constant 0 : index
    %14 = vector.load %arg4[%c0_12, %c0_13, %c0_14] : memref<1x32x32xbf16, #tpu.memory_space<vmem>>, vector<1x32x32xbf16>
    %15 = vector.shape_cast %14 : vector<1x32x32xbf16> to vector<32x32xbf16>
    %cst_15 = arith.constant dense<0.000000e+00> : vector<8x32xf32>
    %16 = tpu.matmul %0, %15, %cst_15 {dimension_numbers = #tpu.dot_dimension_numbers<[1], [0], [0], [1], [0, 0, 1, 1], [], []>} : vector<8x32xbf16>, vector<32x32xbf16>, vector<8x32xf32> -> vector<8x32xf32>
    %c0_16 = arith.constant 0 : index
    %c0_17 = arith.constant 0 : index
    %c0_18 = arith.constant 0 : index
    %17 = vector.load %arg7[%c0_16, %c0_17, %c0_18] : memref<1x1x32xf32, #tpu.memory_space<vmem>>, vector<1x1x32xf32>
    %18 = vector.shape_cast %17 : vector<1x1x32xf32> to vector<1x32xf32>
    %19 = vector.broadcast %18 : vector<1x32xf32> to vector<8x32xf32>
    %20 = arith.addf %16, %19 : vector<8x32xf32>
    %21 = arith.truncf %20 : vector<8x32xf32> to vector<8x32xbf16>
    %c0_19 = arith.constant 0 : index
    %c0_20 = arith.constant 0 : index
    %c0_21 = arith.constant 0 : index
    %c0_22 = arith.constant 0 : index
    %22 = vector.load %arg10[%c0_19, %c0_20, %c0_21, %c0_22] : memref<1x1x8x32xbf16, #tpu.memory_space<vmem>>, vector<1x1x8x32xbf16>
    %23 = vector.shape_cast %22 : vector<1x1x8x32xbf16> to vector<8x32xbf16>
    %24 = vector.shape_cast %21 : vector<8x32xbf16> to vector<1x1x8x32xbf16>
    tpu.vector_store %arg10[%c0_19, %c0_20, %c0_21, %c0_22], %24 {strides = array<i32>} : memref<1x1x8x32xbf16, #tpu.memory_space<vmem>>, vector<1x1x8x32xbf16>,
    %c0_23 = arith.constant 0 : index
    %c0_24 = arith.constant 0 : index
    %c0_25 = arith.constant 0 : index
    %25 = vector.load %arg5[%c0_23, %c0_24, %c0_25] : memref<1x32x32xbf16, #tpu.memory_space<vmem>>, vector<1x32x32xbf16>
    %26 = vector.shape_cast %25 : vector<1x32x32xbf16> to vector<32x32xbf16>
    %cst_26 = arith.constant dense<0.000000e+00> : vector<8x32xf32>
    %27 = tpu.matmul %0, %26, %cst_26 {dimension_numbers = #tpu.dot_dimension_numbers<[1], [0], [0], [1], [0, 0, 1, 1], [], []>} : vector<8x32xbf16>, vector<32x32xbf16>, vector<8x32xf32> -> vector<8x32xf32>
    %c0_27 = arith.constant 0 : index
    %c0_28 = arith.constant 0 : index
    %c0_29 = arith.constant 0 : index
    %28 = vector.load %arg8[%c0_27, %c0_28, %c0_29] : memref<1x1x32xf32, #tpu.memory_space<vmem>>, vector<1x1x32xf32>
    %29 = vector.shape_cast %28 : vector<1x1x32xf32> to vector<1x32xf32>
    %30 = vector.broadcast %29 : vector<1x32xf32> to vector<8x32xf32>
    %31 = arith.addf %27, %30 : vector<8x32xf32>
    %32 = arith.truncf %31 : vector<8x32xf32> to vector<8x32xbf16>
    %c0_30 = arith.constant 0 : index
    %c0_31 = arith.constant 0 : index
    %c0_32 = arith.constant 0 : index
    %c0_33 = arith.constant 0 : index
    %33 = vector.load %arg11[%c0_30, %c0_31, %c0_32, %c0_33] : memref<1x1x8x32xbf16, #tpu.memory_space<vmem>>, vector<1x1x8x32xbf16>
    %34 = vector.shape_cast %33 : vector<1x1x8x32xbf16> to vector<8x32xbf16>
    %35 = vector.shape_cast %32 : vector<8x32xbf16> to vector<1x1x8x32xbf16>
    tpu.vector_store %arg11[%c0_30, %c0_31, %c0_32, %c0_33], %35 {strides = array<i32>} : memref<1x1x8x32xbf16, #tpu.memory_space<vmem>>, vector<1x1x8x32xbf16>,
    return
  }
  func.func @transform_0(%arg0: i32, %arg1: i32) -> (i32, i32) {
    %c0_i32 = arith.constant 0 : i32
    %c0_i32_0 = arith.constant 0 : i32
    return %arg1, %c0_i32 : i32, i32
  }
  func.func @transform_1(%arg0: i32, %arg1: i32) -> (i32, i32, i32) {
    %c0_i32 = arith.constant 0 : i32
    %c0_i32_0 = arith.constant 0 : i32
    %c0_i32_1 = arith.constant 0 : i32
    return %arg0, %c0_i32, %c0_i32_0 : i32, i32, i32
  }
  func.func @transform_2(%arg0: i32, %arg1: i32) -> (i32, i32, i32) {
    %c0_i32 = arith.constant 0 : i32
    %c0_i32_0 = arith.constant 0 : i32
    %c0_i32_1 = arith.constant 0 : i32
    return %arg0, %c0_i32, %c0_i32_0 : i32, i32, i32
  }
  func.func @transform_3(%arg0: i32, %arg1: i32) -> (i32, i32, i32) {
    %c0_i32 = arith.constant 0 : i32
    %c0_i32_0 = arith.constant 0 : i32
    %c0_i32_1 = arith.constant 0 : i32
    return %arg0, %c0_i32, %c0_i32_0 : i32, i32, i32
  }
  func.func @transform_4(%arg0: i32, %arg1: i32) -> (i32, i32, i32) {
    %c0_i32 = arith.constant 0 : i32
    %c0_i32_0 = arith.constant 0 : i32
    %c0_i32_1 = arith.constant 0 : i32
    return %arg0, %c0_i32, %c0_i32_0 : i32, i32, i32
  }
  func.func @transform_5(%arg0: i32, %arg1: i32) -> (i32, i32, i32) {
    %c0_i32 = arith.constant 0 : i32
    %c0_i32_0 = arith.constant 0 : i32
    %c0_i32_1 = arith.constant 0 : i32
    return %arg0, %c0_i32, %c0_i32_0 : i32, i32, i32
  }
  func.func @transform_6(%arg0: i32, %arg1: i32) -> (i32, i32, i32) {
    %c0_i32 = arith.constant 0 : i32
    %c0_i32_0 = arith.constant 0 : i32
    %c0_i32_1 = arith.constant 0 : i32
    return %arg0, %c0_i32, %c0_i32_0 : i32, i32, i32
  }
  func.func @transform_7(%arg0: i32, %arg1: i32) -> (i32, i32, i32, i32) {
    %c0_i32 = arith.constant 0 : i32
    %c0_i32_0 = arith.constant 0 : i32
    %c0_i32_1 = arith.constant 0 : i32
    return %arg1, %arg0, %c0_i32, %c0_i32_0 : i32, i32, i32, i32
  }
  func.func @transform_8(%arg0: i32, %arg1: i32) -> (i32, i32, i32, i32) {
    %c0_i32 = arith.constant 0 : i32
    %c0_i32_0 = arith.constant 0 : i32
    %c0_i32_1 = arith.constant 0 : i32
    return %arg1, %arg0, %c0_i32, %c0_i32_0 : i32, i32, i32, i32
  }
  func.func @transform_9(%arg0: i32, %arg1: i32) -> (i32, i32, i32, i32) {
    %c0_i32 = arith.constant 0 : i32
    %c0_i32_0 = arith.constant 0 : i32
    %c0_i32_1 = arith.constant 0 : i32
    return %arg1, %arg0, %c0_i32, %c0_i32_0 : i32, i32, i32, i32
  }
}

module attributes {stable_mosaic.version = 11 : i64} {
  func.func @_layernorm_kernel(%arg0: i32, %arg1: memref<16x32xf32, #tpu.memory_space<vmem>>, %arg2: memref<1x32xf32, #tpu.memory_space<vmem>>, %arg3: memref<1x32xf32, #tpu.memory_space<vmem>>, %arg4: memref<16x32xbf16, #tpu.memory_space<vmem>>) attributes {dimension_semantics = [#tpu.dimension_semantics<parallel>], iteration_bounds = array<i64: 1>, scalar_prefetch = 0 : i64, scratch_operands = 0 : i64, tpu.core_type = #tpu.core_type<tc>, window_params = [{transform_indices = @transform_0, window_bounds = array<i64: 16, 32>}, {pipeline_mode = #tpu.pipeline_mode<synchronous>, transform_indices = @transform_1, window_bounds = array<i64: 1, 32>}, {pipeline_mode = #tpu.pipeline_mode<synchronous>, transform_indices = @transform_2, window_bounds = array<i64: 1, 32>}, {transform_indices = @transform_3, window_bounds = array<i64: 16, 32>}]} {
    %c0 = arith.constant 0 : index
    %c0_0 = arith.constant 0 : index
    %0 = vector.load %arg1[%c0, %c0_0] : memref<16x32xf32, #tpu.memory_space<vmem>>, vector<16x32xf32>
    %cst = arith.constant dense<0.000000e+00> : vector<16xf32>
    %1 = vector.multi_reduction <add>, %0, %cst [1] : vector<16x32xf32> to vector<16xf32>
    %2 = vector.shape_cast %1 : vector<16xf32> to vector<16x1xf32>
    %cst_1 = arith.constant 3.200000e+01 : f32
    %3 = vector.broadcast %cst_1 : f32 to vector<16x1xf32>
    %4 = arith.divf %2, %3 : vector<16x1xf32>
    %5 = vector.broadcast %4 : vector<16x1xf32> to vector<16x32xf32>
    %6 = arith.subf %0, %5 : vector<16x32xf32>
    %7 = arith.mulf %6, %6 : vector<16x32xf32>
    %cst_2 = arith.constant dense<0.000000e+00> : vector<16xf32>
    %8 = vector.multi_reduction <add>, %7, %cst_2 [1] : vector<16x32xf32> to vector<16xf32>
    %9 = vector.shape_cast %8 : vector<16xf32> to vector<16x1xf32>
    %cst_3 = arith.constant 3.200000e+01 : f32
    %10 = vector.broadcast %cst_3 : f32 to vector<16x1xf32>
    %11 = arith.divf %9, %10 : vector<16x1xf32>
    %12 = vector.broadcast %4 : vector<16x1xf32> to vector<16x32xf32>
    %13 = arith.subf %0, %12 : vector<16x32xf32>
    %cst_4 = arith.constant 9.99999996E-13 : f32
    %14 = vector.broadcast %cst_4 : f32 to vector<16x1xf32>
    %15 = arith.addf %11, %14 : vector<16x1xf32>
    %16 = math.rsqrt %15 : vector<16x1xf32>
    %17 = vector.broadcast %16 : vector<16x1xf32> to vector<16x32xf32>
    %18 = arith.mulf %13, %17 : vector<16x32xf32>
    %c0_5 = arith.constant 0 : index
    %c0_6 = arith.constant 0 : index
    %19 = vector.load %arg2[%c0_5, %c0_6] : memref<1x32xf32, #tpu.memory_space<vmem>>, vector<1x32xf32>
    %20 = vector.broadcast %19 : vector<1x32xf32> to vector<16x32xf32>
    %21 = arith.mulf %18, %20 : vector<16x32xf32>
    %c0_7 = arith.constant 0 : index
    %c0_8 = arith.constant 0 : index
    %22 = vector.load %arg3[%c0_7, %c0_8] : memref<1x32xf32, #tpu.memory_space<vmem>>, vector<1x32xf32>
    %23 = vector.broadcast %22 : vector<1x32xf32> to vector<16x32xf32>
    %24 = arith.addf %21, %23 : vector<16x32xf32>
    %25 = arith.truncf %24 : vector<16x32xf32> to vector<16x32xbf16>
    %c0_9 = arith.constant 0 : index
    %c0_10 = arith.constant 0 : index
    %26 = vector.load %arg4[%c0_9, %c0_10] : memref<16x32xbf16, #tpu.memory_space<vmem>>, vector<16x32xbf16>
    tpu.vector_store %arg4[%c0_9, %c0_10], %25 {strides = array<i32>} : memref<16x32xbf16, #tpu.memory_space<vmem>>, vector<16x32xbf16>,
    return
  }
  func.func @transform_0(%arg0: i32) -> (i32, i32) {
    %c0_i32 = arith.constant 0 : i32
    %c0_i32_0 = arith.constant 0 : i32
    return %arg0, %c0_i32 : i32, i32
  }
  func.func @transform_1(%arg0: i32) -> (i32, i32) {
    %c0_i32 = arith.constant 0 : i32
    %c0_i32_0 = arith.constant 0 : i32
    %c0_i32_1 = arith.constant 0 : i32
    return %c0_i32, %c0_i32_0 : i32, i32
  }
  func.func @transform_2(%arg0: i32) -> (i32, i32) {
    %c0_i32 = arith.constant 0 : i32
    %c0_i32_0 = arith.constant 0 : i32
    %c0_i32_1 = arith.constant 0 : i32
    return %c0_i32, %c0_i32_0 : i32, i32
  }
  func.func @transform_3(%arg0: i32) -> (i32, i32) {
    %c0_i32 = arith.constant 0 : i32
    %c0_i32_0 = arith.constant 0 : i32
    return %arg0, %c0_i32 : i32, i32
  }
}

module attributes {stable_mosaic.version = 11 : i64} {
  func.func @_attention_kernel(%arg0: i32, %arg1: i32, %arg2: memref<1x1x8x32xbf16, #tpu.memory_space<vmem>>, %arg3: memref<1x1x8x32xbf16, #tpu.memory_space<vmem>>, %arg4: memref<1x1x8x32xbf16, #tpu.memory_space<vmem>>, %arg5: memref<1x1x8x32xbf16, #tpu.memory_space<vmem>>) attributes {dimension_semantics = [#tpu.dimension_semantics<parallel>, #tpu.dimension_semantics<parallel>], iteration_bounds = array<i64: 2, 1>, scalar_prefetch = 0 : i64, scratch_operands = 0 : i64, tpu.core_type = #tpu.core_type<tc>, window_params = [{transform_indices = @transform_0, window_bounds = array<i64: 1, 1, 8, 32>}, {transform_indices = @transform_1, window_bounds = array<i64: 1, 1, 8, 32>}, {transform_indices = @transform_2, window_bounds = array<i64: 1, 1, 8, 32>}, {transform_indices = @transform_3, window_bounds = array<i64: 1, 1, 8, 32>}]} {
    %c0 = arith.constant 0 : index
    %c0_0 = arith.constant 0 : index
    %c0_1 = arith.constant 0 : index
    %c0_2 = arith.constant 0 : index
    %0 = vector.load %arg2[%c0, %c0_0, %c0_1, %c0_2] : memref<1x1x8x32xbf16, #tpu.memory_space<vmem>>, vector<1x1x8x32xbf16>
    %1 = vector.shape_cast %0 : vector<1x1x8x32xbf16> to vector<8x32xbf16>
    %c0_3 = arith.constant 0 : index
    %c0_4 = arith.constant 0 : index
    %c0_5 = arith.constant 0 : index
    %c0_6 = arith.constant 0 : index
    %2 = vector.load %arg3[%c0_3, %c0_4, %c0_5, %c0_6] : memref<1x1x8x32xbf16, #tpu.memory_space<vmem>>, vector<1x1x8x32xbf16>
    %3 = vector.shape_cast %2 : vector<1x1x8x32xbf16> to vector<8x32xbf16>
    %c0_7 = arith.constant 0 : index
    %c0_8 = arith.constant 0 : index
    %c0_9 = arith.constant 0 : index
    %c0_10 = arith.constant 0 : index
    %4 = vector.load %arg4[%c0_7, %c0_8, %c0_9, %c0_10] : memref<1x1x8x32xbf16, #tpu.memory_space<vmem>>, vector<1x1x8x32xbf16>
    %5 = vector.shape_cast %4 : vector<1x1x8x32xbf16> to vector<8x32xbf16>
    %6 = vector.extract_strided_slice %1 {offsets = [0, 0], sizes = [8, 16], strides = [1, 1]} : vector<8x32xbf16> to vector<8x16xbf16>
    %7 = vector.extract_strided_slice %3 {offsets = [0, 0], sizes = [8, 16], strides = [1, 1]} : vector<8x32xbf16> to vector<8x16xbf16>
    %cst = arith.constant dense<0.000000e+00> : vector<8x8xf32>
    %8 = tpu.matmul %6, %7, %cst {dimension_numbers = #tpu.dot_dimension_numbers<[1], [1], [0], [0], [0, 0, 1, 0], [], []>} : vector<8x16xbf16>, vector<8x16xbf16>, vector<8x8xf32> -> vector<8x8xf32>
    %cst_11 = arith.constant dense<0xFF800000> : vector<8xf32>
    %9 = vector.multi_reduction <maximumf>, %8, %cst_11 [1] : vector<8x8xf32> to vector<8xf32>
    %10 = vector.shape_cast %9 : vector<8xf32> to vector<8x1xf32>
    %11 = vector.broadcast %10 : vector<8x1xf32> to vector<8x8xf32>
    %12 = arith.subf %8, %11 : vector<8x8xf32>
    %13 = arith.truncf %12 : vector<8x8xf32> to vector<8x8xbf16>
    %14 = math.exp %13 : vector<8x8xbf16>
    %15 = arith.extf %14 : vector<8x8xbf16> to vector<8x8xf32>
    %cst_12 = arith.constant dense<0.000000e+00> : vector<8xf32>
    %16 = vector.multi_reduction <add>, %15, %cst_12 [1] : vector<8x8xf32> to vector<8xf32>
    %17 = vector.shape_cast %16 : vector<8xf32> to vector<8x1xf32>
    %18 = vector.extract_strided_slice %5 {offsets = [0, 0], sizes = [8, 16], strides = [1, 1]} : vector<8x32xbf16> to vector<8x16xbf16>
    %cst_13 = arith.constant dense<0.000000e+00> : vector<8x16xf32>
    %19 = tpu.matmul %14, %18, %cst_13 {dimension_numbers = #tpu.dot_dimension_numbers<[1], [0], [0], [1], [0, 0, 1, 1], [], []>} : vector<8x8xbf16>, vector<8x16xbf16>, vector<8x16xf32> -> vector<8x16xf32>
    %20 = tpu.reciprocal %17 {approx = true} : vector<8x1xf32> -> vector<8x1xf32>
    %21 = vector.broadcast %20 : vector<8x1xf32> to vector<8x16xf32>
    %22 = arith.mulf %19, %21 : vector<8x16xf32>
    %23 = vector.extract_strided_slice %1 {offsets = [0, 16], sizes = [8, 16], strides = [1, 1]} : vector<8x32xbf16> to vector<8x16xbf16>
    %24 = vector.extract_strided_slice %3 {offsets = [0, 16], sizes = [8, 16], strides = [1, 1]} : vector<8x32xbf16> to vector<8x16xbf16>
    %cst_14 = arith.constant dense<0.000000e+00> : vector<8x8xf32>
    %25 = tpu.matmul %23, %24, %cst_14 {dimension_numbers = #tpu.dot_dimension_numbers<[1], [1], [0], [0], [0, 0, 1, 0], [], []>} : vector<8x16xbf16>, vector<8x16xbf16>, vector<8x8xf32> -> vector<8x8xf32>
    %cst_15 = arith.constant dense<0xFF800000> : vector<8xf32>
    %26 = vector.multi_reduction <maximumf>, %25, %cst_15 [1] : vector<8x8xf32> to vector<8xf32>
    %27 = vector.shape_cast %26 : vector<8xf32> to vector<8x1xf32>
    %28 = vector.broadcast %27 : vector<8x1xf32> to vector<8x8xf32>
    %29 = arith.subf %25, %28 : vector<8x8xf32>
    %30 = arith.truncf %29 : vector<8x8xf32> to vector<8x8xbf16>
    %31 = math.exp %30 : vector<8x8xbf16>
    %32 = arith.extf %31 : vector<8x8xbf16> to vector<8x8xf32>
    %cst_16 = arith.constant dense<0.000000e+00> : vector<8xf32>
    %33 = vector.multi_reduction <add>, %32, %cst_16 [1] : vector<8x8xf32> to vector<8xf32>
    %34 = vector.shape_cast %33 : vector<8xf32> to vector<8x1xf32>
    %35 = vector.extract_strided_slice %5 {offsets = [0, 16], sizes = [8, 16], strides = [1, 1]} : vector<8x32xbf16> to vector<8x16xbf16>
    %cst_17 = arith.constant dense<0.000000e+00> : vector<8x16xf32>
    %36 = tpu.matmul %31, %35, %cst_17 {dimension_numbers = #tpu.dot_dimension_numbers<[1], [0], [0], [1], [0, 0, 1, 1], [], []>} : vector<8x8xbf16>, vector<8x16xbf16>, vector<8x16xf32> -> vector<8x16xf32>
    %37 = tpu.reciprocal %34 {approx = true} : vector<8x1xf32> -> vector<8x1xf32>
    %38 = vector.broadcast %37 : vector<8x1xf32> to vector<8x16xf32>
    %39 = arith.mulf %36, %38 : vector<8x16xf32>
    %40 = tpu.concatenate %22, %39 in 1 : vector<8x16xf32>, vector<8x16xf32> -> vector<8x32xf32>
    %41 = arith.truncf %40 : vector<8x32xf32> to vector<8x32xbf16>
    %c0_18 = arith.constant 0 : index
    %c0_19 = arith.constant 0 : index
    %c0_20 = arith.constant 0 : index
    %c0_21 = arith.constant 0 : index
    %42 = vector.load %arg5[%c0_18, %c0_19, %c0_20, %c0_21] : memref<1x1x8x32xbf16, #tpu.memory_space<vmem>>, vector<1x1x8x32xbf16>
    %43 = vector.shape_cast %42 : vector<1x1x8x32xbf16> to vector<8x32xbf16>
    %44 = vector.shape_cast %41 : vector<8x32xbf16> to vector<1x1x8x32xbf16>
    tpu.vector_store %arg5[%c0_18, %c0_19, %c0_20, %c0_21], %44 {strides = array<i32>} : memref<1x1x8x32xbf16, #tpu.memory_space<vmem>>, vector<1x1x8x32xbf16>,
    return
  }
  func.func @transform_0(%arg0: i32, %arg1: i32) -> (i32, i32, i32, i32) {
    %c0_i32 = arith.constant 0 : i32
    %c0_i32_0 = arith.constant 0 : i32
    %c0_i32_1 = arith.constant 0 : i32
    return %arg0, %arg1, %c0_i32, %c0_i32_0 : i32, i32, i32, i32
  }
  func.func @transform_1(%arg0: i32, %arg1: i32) -> (i32, i32, i32, i32) {
    %c0_i32 = arith.constant 0 : i32
    %c0_i32_0 = arith.constant 0 : i32
    %c0_i32_1 = arith.constant 0 : i32
    return %arg0, %arg1, %c0_i32, %c0_i32_0 : i32, i32, i32, i32
  }
  func.func @transform_2(%arg0: i32, %arg1: i32) -> (i32, i32, i32, i32) {
    %c0_i32 = arith.constant 0 : i32
    %c0_i32_0 = arith.constant 0 : i32
    %c0_i32_1 = arith.constant 0 : i32
    return %arg0, %arg1, %c0_i32, %c0_i32_0 : i32, i32, i32, i32
  }
  func.func @transform_3(%arg0: i32, %arg1: i32) -> (i32, i32, i32, i32) {
    %c0_i32 = arith.constant 0 : i32
    %c0_i32_0 = arith.constant 0 : i32
    %c0_i32_1 = arith.constant 0 : i32
    return %arg0, %arg1, %c0_i32, %c0_i32_0 : i32, i32, i32, i32
  }
}

module attributes {stable_mosaic.version = 11 : i64} {
  func.func @_attn_out_res_ln_kernel(%arg0: i32, %arg1: i32, %arg2: memref<1x1x8x32xbf16, #tpu.memory_space<vmem>>, %arg3: memref<1x32x32xbf16, #tpu.memory_space<vmem>>, %arg4: memref<1x32xf32, #tpu.memory_space<vmem>>, %arg5: memref<8x32xbf16, #tpu.memory_space<vmem>>, %arg6: memref<1x32xf32, #tpu.memory_space<vmem>>, %arg7: memref<1x32xf32, #tpu.memory_space<vmem>>, %arg8: memref<8x32xbf16, #tpu.memory_space<vmem>>, %arg9: memref<8x32xf32, #tpu.memory_space<vmem>>) attributes {dimension_semantics = [#tpu.dimension_semantics<parallel>, #tpu.dimension_semantics<arbitrary>], iteration_bounds = array<i64: 2, 1>, scalar_prefetch = 0 : i64, scratch_operands = 1 : i64, tpu.core_type = #tpu.core_type<tc>, window_params = [{transform_indices = @transform_0, window_bounds = array<i64: 1, 1, 8, 32>}, {transform_indices = @transform_1, window_bounds = array<i64: 1, 32, 32>}, {pipeline_mode = #tpu.pipeline_mode<synchronous>, transform_indices = @transform_2, window_bounds = array<i64: 1, 32>}, {transform_indices = @transform_3, window_bounds = array<i64: 8, 32>}, {pipeline_mode = #tpu.pipeline_mode<synchronous>, transform_indices = @transform_4, window_bounds = array<i64: 1, 32>}, {pipeline_mode = #tpu.pipeline_mode<synchronous>, transform_indices = @transform_5, window_bounds = array<i64: 1, 32>}, {transform_indices = @transform_6, window_bounds = array<i64: 8, 32>}]} {
    %c0_i32 = arith.constant 0 : i32
    %0 = arith.cmpi eq, %arg1, %c0_i32 : i32
    %1 = arith.extui %0 : i1 to i32
    %c0_i32_0 = arith.constant 0 : i32
    %2 = arith.cmpi ne, %1, %c0_i32_0 : i32
    scf.if %2 {
      %cst_13 = arith.constant 0.000000e+00 : f32
      %14 = vector.broadcast %cst_13 : f32 to vector<8x32xf32>
      %c0_14 = arith.constant 0 : index
      %c0_15 = arith.constant 0 : index
      %15 = vector.load %arg9[%c0_14, %c0_15] : memref<8x32xf32, #tpu.memory_space<vmem>>, vector<8x32xf32>
      tpu.vector_store %arg9[%c0_14, %c0_15], %14 {strides = array<i32>} : memref<8x32xf32, #tpu.memory_space<vmem>>, vector<8x32xf32>,
    } else {
    }
    %c0 = arith.constant 0 : index
    %c0_1 = arith.constant 0 : index
    %3 = vector.load %arg9[%c0, %c0_1] : memref<8x32xf32, #tpu.memory_space<vmem>>, vector<8x32xf32>
    %c0_2 = arith.constant 0 : index
    %c0_3 = arith.constant 0 : index
    %c0_4 = arith.constant 0 : index
    %c0_5 = arith.constant 0 : index
    %4 = vector.load %arg2[%c0_2, %c0_3, %c0_4, %c0_5] : memref<1x1x8x32xbf16, #tpu.memory_space<vmem>>, vector<1x1x8x32xbf16>
    %5 = vector.shape_cast %4 : vector<1x1x8x32xbf16> to vector<8x32xbf16>
    %c0_6 = arith.constant 0 : index
    %c0_7 = arith.constant 0 : index
    %c0_8 = arith.constant 0 : index
    %6 = vector.load %arg3[%c0_6, %c0_7, %c0_8] : memref<1x32x32xbf16, #tpu.memory_space<vmem>>, vector<1x32x32xbf16>
    %7 = vector.shape_cast %6 : vector<1x32x32xbf16> to vector<32x32xbf16>
    %cst = arith.constant dense<0.000000e+00> : vector<8x32xf32>
    %8 = tpu.matmul %5, %7, %cst {dimension_numbers = #tpu.dot_dimension_numbers<[1], [0], [0], [1], [0, 0, 1, 1], [], []>} : vector<8x32xbf16>, vector<32x32xbf16>, vector<8x32xf32> -> vector<8x32xf32>
    %9 = arith.addf %3, %8 : vector<8x32xf32>
    %c0_9 = arith.constant 0 : index
    %c0_10 = arith.constant 0 : index
    %10 = vector.load %arg9[%c0_9, %c0_10] : memref<8x32xf32, #tpu.memory_space<vmem>>, vector<8x32xf32>
    tpu.vector_store %arg9[%c0_9, %c0_10], %9 {strides = array<i32>} : memref<8x32xf32, #tpu.memory_space<vmem>>, vector<8x32xf32>,
    %c0_i32_11 = arith.constant 0 : i32
    %11 = arith.cmpi eq, %arg1, %c0_i32_11 : i32
    %12 = arith.extui %11 : i1 to i32
    %c0_i32_12 = arith.constant 0 : i32
    %13 = arith.cmpi ne, %12, %c0_i32_12 : i32
    scf.if %13 {
      %c0_13 = arith.constant 0 : index
      %c0_14 = arith.constant 0 : index
      %14 = vector.load %arg9[%c0_13, %c0_14] : memref<8x32xf32, #tpu.memory_space<vmem>>, vector<8x32xf32>
      %c0_15 = arith.constant 0 : index
      %c0_16 = arith.constant 0 : index
      %15 = vector.load %arg4[%c0_15, %c0_16] : memref<1x32xf32, #tpu.memory_space<vmem>>, vector<1x32xf32>
      %16 = vector.broadcast %15 : vector<1x32xf32> to vector<8x32xf32>
      %17 = arith.addf %14, %16 : vector<8x32xf32>
      %c0_17 = arith.constant 0 : index
      %c0_18 = arith.constant 0 : index
      %18 = vector.load %arg5[%c0_17, %c0_18] : memref<8x32xbf16, #tpu.memory_space<vmem>>, vector<8x32xbf16>
      %19 = arith.extf %18 : vector<8x32xbf16> to vector<8x32xf32>
      %20 = arith.addf %17, %19 : vector<8x32xf32>
      %cst_19 = arith.constant dense<0.000000e+00> : vector<8xf32>
      %21 = vector.multi_reduction <add>, %20, %cst_19 [1] : vector<8x32xf32> to vector<8xf32>
      %22 = vector.shape_cast %21 : vector<8xf32> to vector<8x1xf32>
      %cst_20 = arith.constant 3.200000e+01 : f32
      %23 = vector.broadcast %cst_20 : f32 to vector<8x1xf32>
      %24 = arith.divf %22, %23 : vector<8x1xf32>
      %25 = vector.broadcast %24 : vector<8x1xf32> to vector<8x32xf32>
      %26 = arith.subf %20, %25 : vector<8x32xf32>
      %27 = arith.mulf %26, %26 : vector<8x32xf32>
      %cst_21 = arith.constant dense<0.000000e+00> : vector<8xf32>
      %28 = vector.multi_reduction <add>, %27, %cst_21 [1] : vector<8x32xf32> to vector<8xf32>
      %29 = vector.shape_cast %28 : vector<8xf32> to vector<8x1xf32>
      %cst_22 = arith.constant 3.200000e+01 : f32
      %30 = vector.broadcast %cst_22 : f32 to vector<8x1xf32>
      %31 = arith.divf %29, %30 : vector<8x1xf32>
      %32 = vector.broadcast %24 : vector<8x1xf32> to vector<8x32xf32>
      %33 = arith.subf %20, %32 : vector<8x32xf32>
      %cst_23 = arith.constant 9.99999996E-13 : f32
      %34 = vector.broadcast %cst_23 : f32 to vector<8x1xf32>
      %35 = arith.addf %31, %34 : vector<8x1xf32>
      %36 = math.rsqrt %35 : vector<8x1xf32>
      %37 = vector.broadcast %36 : vector<8x1xf32> to vector<8x32xf32>
      %38 = arith.mulf %33, %37 : vector<8x32xf32>
      %c0_24 = arith.constant 0 : index
      %c0_25 = arith.constant 0 : index
      %39 = vector.load %arg6[%c0_24, %c0_25] : memref<1x32xf32, #tpu.memory_space<vmem>>, vector<1x32xf32>
      %40 = vector.broadcast %39 : vector<1x32xf32> to vector<8x32xf32>
      %41 = arith.mulf %38, %40 : vector<8x32xf32>
      %c0_26 = arith.constant 0 : index
      %c0_27 = arith.constant 0 : index
      %42 = vector.load %arg7[%c0_26, %c0_27] : memref<1x32xf32, #tpu.memory_space<vmem>>, vector<1x32xf32>
      %43 = vector.broadcast %42 : vector<1x32xf32> to vector<8x32xf32>
      %44 = arith.addf %41, %43 : vector<8x32xf32>
      %45 = arith.truncf %44 : vector<8x32xf32> to vector<8x32xbf16>
      %c0_28 = arith.constant 0 : index
      %c0_29 = arith.constant 0 : index
      %46 = vector.load %arg8[%c0_28, %c0_29] : memref<8x32xbf16, #tpu.memory_space<vmem>>, vector<8x32xbf16>
      tpu.vector_store %arg8[%c0_28, %c0_29], %45 {strides = array<i32>} : memref<8x32xbf16, #tpu.memory_space<vmem>>, vector<8x32xbf16>,
    } else {
    }
    return
  }
  func.func @transform_0(%arg0: i32, %arg1: i32) -> (i32, i32, i32, i32) {
    %c0_i32 = arith.constant 0 : i32
    %c0_i32_0 = arith.constant 0 : i32
    %c0_i32_1 = arith.constant 0 : i32
    return %arg0, %arg1, %c0_i32, %c0_i32_0 : i32, i32, i32, i32
  }
  func.func @transform_1(%arg0: i32, %arg1: i32) -> (i32, i32, i32) {
    %c0_i32 = arith.constant 0 : i32
    %c0_i32_0 = arith.constant 0 : i32
    %c0_i32_1 = arith.constant 0 : i32
    return %arg1, %c0_i32, %c0_i32_0 : i32, i32, i32
  }
  func.func @transform_2(%arg0: i32, %arg1: i32) -> (i32, i32) {
    %c0_i32 = arith.constant 0 : i32
    %c0_i32_0 = arith.constant 0 : i32
    %c0_i32_1 = arith.constant 0 : i32
    return %c0_i32, %c0_i32_0 : i32, i32
  }
  func.func @transform_3(%arg0: i32, %arg1: i32) -> (i32, i32) {
    %c0_i32 = arith.constant 0 : i32
    %c0_i32_0 = arith.constant 0 : i32
    return %arg0, %c0_i32 : i32, i32
  }
  func.func @transform_4(%arg0: i32, %arg1: i32) -> (i32, i32) {
    %c0_i32 = arith.constant 0 : i32
    %c0_i32_0 = arith.constant 0 : i32
    %c0_i32_1 = arith.constant 0 : i32
    return %c0_i32, %c0_i32_0 : i32, i32
  }
  func.func @transform_5(%arg0: i32, %arg1: i32) -> (i32, i32) {
    %c0_i32 = arith.constant 0 : i32
    %c0_i32_0 = arith.constant 0 : i32
    %c0_i32_1 = arith.constant 0 : i32
    return %c0_i32, %c0_i32_0 : i32, i32
  }
  func.func @transform_6(%arg0: i32, %arg1: i32) -> (i32, i32) {
    %c0_i32 = arith.constant 0 : i32
    %c0_i32_0 = arith.constant 0 : i32
    return %arg0, %c0_i32 : i32, i32
  }
}

module attributes {stable_mosaic.version = 11 : i64} {
  func.func @_matmul_kernel(%arg0: i32, %arg1: i32, %arg2: i32, %arg3: memref<16x32xbf16, #tpu.memory_space<vmem>>, %arg4: memref<32x64xbf16, #tpu.memory_space<vmem>>, %arg5: memref<1x64xf32, #tpu.memory_space<vmem>>, %arg6: memref<16x64xbf16, #tpu.memory_space<vmem>>, %arg7: memref<16x64xf32, #tpu.memory_space<vmem>>) attributes {dimension_semantics = [#tpu.dimension_semantics<parallel>, #tpu.dimension_semantics<parallel>, #tpu.dimension_semantics<arbitrary>], iteration_bounds = array<i64: 1, 1, 1>, scalar_prefetch = 0 : i64, scratch_operands = 1 : i64, tpu.core_type = #tpu.core_type<tc>, window_params = [{transform_indices = @transform_0, window_bounds = array<i64: 16, 32>}, {transform_indices = @transform_1, window_bounds = array<i64: 32, 64>}, {transform_indices = @transform_2, window_bounds = array<i64: 1, 64>}, {transform_indices = @transform_3, window_bounds = array<i64: 16, 64>}]} {
    %c0_i32 = arith.constant 0 : i32
    %0 = arith.cmpi eq, %arg2, %c0_i32 : i32
    %1 = arith.extui %0 : i1 to i32
    %c0_i32_0 = arith.constant 0 : i32
    %2 = arith.cmpi ne, %1, %c0_i32_0 : i32
    scf.if %2 {
      %cst_10 = arith.constant 0.000000e+00 : f32
      %12 = vector.broadcast %cst_10 : f32 to vector<16x64xf32>
      %c0_11 = arith.constant 0 : index
      %c0_12 = arith.constant 0 : index
      %13 = vector.load %arg7[%c0_11, %c0_12] : memref<16x64xf32, #tpu.memory_space<vmem>>, vector<16x64xf32>
      tpu.vector_store %arg7[%c0_11, %c0_12], %12 {strides = array<i32>} : memref<16x64xf32, #tpu.memory_space<vmem>>, vector<16x64xf32>,
    } else {
    }
    %c0 = arith.constant 0 : index
    %c0_1 = arith.constant 0 : index
    %3 = vector.load %arg7[%c0, %c0_1] : memref<16x64xf32, #tpu.memory_space<vmem>>, vector<16x64xf32>
    %c0_2 = arith.constant 0 : index
    %c0_3 = arith.constant 0 : index
    %4 = vector.load %arg3[%c0_2, %c0_3] : memref<16x32xbf16, #tpu.memory_space<vmem>>, vector<16x32xbf16>
    %c0_4 = arith.constant 0 : index
    %c0_5 = arith.constant 0 : index
    %5 = vector.load %arg4[%c0_4, %c0_5] : memref<32x64xbf16, #tpu.memory_space<vmem>>, vector<32x64xbf16>
    %cst = arith.constant dense<0.000000e+00> : vector<16x64xf32>
    %6 = tpu.matmul %4, %5, %cst {dimension_numbers = #tpu.dot_dimension_numbers<[1], [0], [0], [1], [0, 0, 1, 1], [], []>} : vector<16x32xbf16>, vector<32x64xbf16>, vector<16x64xf32> -> vector<16x64xf32>
    %7 = arith.addf %3, %6 : vector<16x64xf32>
    %c0_6 = arith.constant 0 : index
    %c0_7 = arith.constant 0 : index
    %8 = vector.load %arg7[%c0_6, %c0_7] : memref<16x64xf32, #tpu.memory_space<vmem>>, vector<16x64xf32>
    tpu.vector_store %arg7[%c0_6, %c0_7], %7 {strides = array<i32>} : memref<16x64xf32, #tpu.memory_space<vmem>>, vector<16x64xf32>,
    %c0_i32_8 = arith.constant 0 : i32
    %9 = arith.cmpi eq, %arg2, %c0_i32_8 : i32
    %10 = arith.extui %9 : i1 to i32
    %c0_i32_9 = arith.constant 0 : i32
    %11 = arith.cmpi ne, %10, %c0_i32_9 : i32
    scf.if %11 {
      %c0_10 = arith.constant 0 : index
      %c0_11 = arith.constant 0 : index
      %12 = vector.load %arg7[%c0_10, %c0_11] : memref<16x64xf32, #tpu.memory_space<vmem>>, vector<16x64xf32>
      %c0_12 = arith.constant 0 : index
      %c0_13 = arith.constant 0 : index
      %13 = vector.load %arg5[%c0_12, %c0_13] : memref<1x64xf32, #tpu.memory_space<vmem>>, vector<1x64xf32>
      %14 = vector.broadcast %13 : vector<1x64xf32> to vector<16x64xf32>
      %15 = arith.addf %12, %14 : vector<16x64xf32>
      %16 = arith.mulf %15, %15 : vector<16x64xf32>
      %17 = arith.mulf %15, %16 : vector<16x64xf32>
      %cst_14 = arith.constant 4.471500e-02 : f32
      %18 = vector.broadcast %cst_14 : f32 to vector<16x64xf32>
      %19 = arith.mulf %18, %17 : vector<16x64xf32>
      %20 = arith.addf %15, %19 : vector<16x64xf32>
      %cst_15 = arith.constant 0.797884583 : f32
      %21 = vector.broadcast %cst_15 : f32 to vector<16x64xf32>
      %22 = arith.mulf %21, %20 : vector<16x64xf32>
      %23 = math.tanh %22 : vector<16x64xf32>
      %cst_16 = arith.constant 1.000000e+00 : f32
      %24 = vector.broadcast %cst_16 : f32 to vector<16x64xf32>
      %25 = arith.addf %24, %23 : vector<16x64xf32>
      %cst_17 = arith.constant 5.000000e-01 : f32
      %26 = vector.broadcast %cst_17 : f32 to vector<16x64xf32>
      %27 = arith.mulf %26, %25 : vector<16x64xf32>
      %28 = arith.mulf %15, %27 : vector<16x64xf32>
      %29 = arith.truncf %28 : vector<16x64xf32> to vector<16x64xbf16>
      %c0_18 = arith.constant 0 : index
      %c0_19 = arith.constant 0 : index
      %30 = vector.load %arg6[%c0_18, %c0_19] : memref<16x64xbf16, #tpu.memory_space<vmem>>, vector<16x64xbf16>
      tpu.vector_store %arg6[%c0_18, %c0_19], %29 {strides = array<i32>} : memref<16x64xbf16, #tpu.memory_space<vmem>>, vector<16x64xbf16>,
    } else {
    }
    return
  }
  func.func @transform_0(%arg0: i32, %arg1: i32, %arg2: i32) -> (i32, i32) {
    %c0_i32 = arith.constant 0 : i32
    return %arg0, %arg2 : i32, i32
  }
  func.func @transform_1(%arg0: i32, %arg1: i32, %arg2: i32) -> (i32, i32) {
    %c0_i32 = arith.constant 0 : i32
    return %arg2, %arg1 : i32, i32
  }
  func.func @transform_2(%arg0: i32, %arg1: i32, %arg2: i32) -> (i32, i32) {
    %c0_i32 = arith.constant 0 : i32
    %c0_i32_0 = arith.constant 0 : i32
    return %c0_i32, %arg1 : i32, i32
  }
  func.func @transform_3(%arg0: i32, %arg1: i32, %arg2: i32) -> (i32, i32) {
    %c0_i32 = arith.constant 0 : i32
    return %arg0, %arg1 : i32, i32
  }
}

module attributes {stable_mosaic.version = 11 : i64} {
  func.func @_matmul_kernel(%arg0: i32, %arg1: i32, %arg2: i32, %arg3: memref<16x32xbf16, #tpu.memory_space<vmem>>, %arg4: memref<32x128xbf16, #tpu.memory_space<vmem>>, %arg5: memref<1x128xf32, #tpu.memory_space<vmem>>, %arg6: memref<16x128xf32, #tpu.memory_space<vmem>>, %arg7: memref<16x128xf32, #tpu.memory_space<vmem>>) attributes {dimension_semantics = [#tpu.dimension_semantics<parallel>, #tpu.dimension_semantics<parallel>, #tpu.dimension_semantics<arbitrary>], iteration_bounds = array<i64: 1, 1, 1>, scalar_prefetch = 0 : i64, scratch_operands = 1 : i64, tpu.core_type = #tpu.core_type<tc>, window_params = [{transform_indices = @transform_0, window_bounds = array<i64: 16, 32>}, {transform_indices = @transform_1, window_bounds = array<i64: 32, 128>}, {transform_indices = @transform_2, window_bounds = array<i64: 1, 128>}, {transform_indices = @transform_3, window_bounds = array<i64: 16, 128>}]} {
    %c0_i32 = arith.constant 0 : i32
    %0 = arith.cmpi eq, %arg2, %c0_i32 : i32
    %1 = arith.extui %0 : i1 to i32
    %c0_i32_0 = arith.constant 0 : i32
    %2 = arith.cmpi ne, %1, %c0_i32_0 : i32
    scf.if %2 {
      %cst_10 = arith.constant 0.000000e+00 : f32
      %12 = vector.broadcast %cst_10 : f32 to vector<16x128xf32>
      %c0_11 = arith.constant 0 : index
      %c0_12 = arith.constant 0 : index
      %13 = vector.load %arg7[%c0_11, %c0_12] : memref<16x128xf32, #tpu.memory_space<vmem>>, vector<16x128xf32>
      tpu.vector_store %arg7[%c0_11, %c0_12], %12 {strides = array<i32>} : memref<16x128xf32, #tpu.memory_space<vmem>>, vector<16x128xf32>,
    } else {
    }
    %c0 = arith.constant 0 : index
    %c0_1 = arith.constant 0 : index
    %3 = vector.load %arg7[%c0, %c0_1] : memref<16x128xf32, #tpu.memory_space<vmem>>, vector<16x128xf32>
    %c0_2 = arith.constant 0 : index
    %c0_3 = arith.constant 0 : index
    %4 = vector.load %arg3[%c0_2, %c0_3] : memref<16x32xbf16, #tpu.memory_space<vmem>>, vector<16x32xbf16>
    %c0_4 = arith.constant 0 : index
    %c0_5 = arith.constant 0 : index
    %5 = vector.load %arg4[%c0_4, %c0_5] : memref<32x128xbf16, #tpu.memory_space<vmem>>, vector<32x128xbf16>
    %cst = arith.constant dense<0.000000e+00> : vector<16x128xf32>
    %6 = tpu.matmul %4, %5, %cst {dimension_numbers = #tpu.dot_dimension_numbers<[1], [0], [0], [1], [0, 0, 1, 1], [], []>} : vector<16x32xbf16>, vector<32x128xbf16>, vector<16x128xf32> -> vector<16x128xf32>
    %7 = arith.addf %3, %6 : vector<16x128xf32>
    %c0_6 = arith.constant 0 : index
    %c0_7 = arith.constant 0 : index
    %8 = vector.load %arg7[%c0_6, %c0_7] : memref<16x128xf32, #tpu.memory_space<vmem>>, vector<16x128xf32>
    tpu.vector_store %arg7[%c0_6, %c0_7], %7 {strides = array<i32>} : memref<16x128xf32, #tpu.memory_space<vmem>>, vector<16x128xf32>,
    %c0_i32_8 = arith.constant 0 : i32
    %9 = arith.cmpi eq, %arg2, %c0_i32_8 : i32
    %10 = arith.extui %9 : i1 to i32
    %c0_i32_9 = arith.constant 0 : i32
    %11 = arith.cmpi ne, %10, %c0_i32_9 : i32
    scf.if %11 {
      %c0_10 = arith.constant 0 : index
      %c0_11 = arith.constant 0 : index
      %12 = vector.load %arg7[%c0_10, %c0_11] : memref<16x128xf32, #tpu.memory_space<vmem>>, vector<16x128xf32>
      %c0_12 = arith.constant 0 : index
      %c0_13 = arith.constant 0 : index
      %13 = vector.load %arg5[%c0_12, %c0_13] : memref<1x128xf32, #tpu.memory_space<vmem>>, vector<1x128xf32>
      %14 = vector.broadcast %13 : vector<1x128xf32> to vector<16x128xf32>
      %15 = arith.addf %12, %14 : vector<16x128xf32>
      %c0_14 = arith.constant 0 : index
      %c0_15 = arith.constant 0 : index
      %16 = vector.load %arg6[%c0_14, %c0_15] : memref<16x128xf32, #tpu.memory_space<vmem>>, vector<16x128xf32>
      tpu.vector_store %arg6[%c0_14, %c0_15], %15 {strides = array<i32>} : memref<16x128xf32, #tpu.memory_space<vmem>>, vector<16x128xf32>,
    } else {
    }
    return
  }
  func.func @transform_0(%arg0: i32, %arg1: i32, %arg2: i32) -> (i32, i32) {
    %c0_i32 = arith.constant 0 : i32
    return %arg0, %arg2 : i32, i32
  }
  func.func @transform_1(%arg0: i32, %arg1: i32, %arg2: i32) -> (i32, i32) {
    %c0_i32 = arith.constant 0 : i32
    return %arg2, %arg1 : i32, i32
  }
  func.func @transform_2(%arg0: i32, %arg1: i32, %arg2: i32) -> (i32, i32) {
    %c0_i32 = arith.constant 0 : i32
    %c0_i32_0 = arith.constant 0 : i32
    return %c0_i32, %arg1 : i32, i32
  }
  func.func @transform_3(%arg0: i32, %arg1: i32, %arg2: i32) -> (i32, i32) {
    %c0_i32 = arith.constant 0 : i32
    return %arg0, %arg1 : i32, i32
  }
}

module attributes {stable_mosaic.version = 11 : i64} {
  func.func @_matmul_res_ln_kernel(%arg0: i32, %arg1: i32, %arg2: memref<16x64xbf16, #tpu.memory_space<vmem>>, %arg3: memref<64x32xbf16, #tpu.memory_space<vmem>>, %arg4: memref<1x32xf32, #tpu.memory_space<vmem>>, %arg5: memref<16x32xbf16, #tpu.memory_space<vmem>>, %arg6: memref<1x32xf32, #tpu.memory_space<vmem>>, %arg7: memref<1x32xf32, #tpu.memory_space<vmem>>, %arg8: memref<16x32xbf16, #tpu.memory_space<vmem>>, %arg9: memref<16x32xf32, #tpu.memory_space<vmem>>) attributes {dimension_semantics = [#tpu.dimension_semantics<parallel>, #tpu.dimension_semantics<arbitrary>], iteration_bounds = array<i64: 1, 1>, scalar_prefetch = 0 : i64, scratch_operands = 1 : i64, tpu.core_type = #tpu.core_type<tc>, window_params = [{transform_indices = @transform_0, window_bounds = array<i64: 16, 64>}, {transform_indices = @transform_1, window_bounds = array<i64: 64, 32>}, {pipeline_mode = #tpu.pipeline_mode<synchronous>, transform_indices = @transform_2, window_bounds = array<i64: 1, 32>}, {transform_indices = @transform_3, window_bounds = array<i64: 16, 32>}, {pipeline_mode = #tpu.pipeline_mode<synchronous>, transform_indices = @transform_4, window_bounds = array<i64: 1, 32>}, {pipeline_mode = #tpu.pipeline_mode<synchronous>, transform_indices = @transform_5, window_bounds = array<i64: 1, 32>}, {transform_indices = @transform_6, window_bounds = array<i64: 16, 32>}]} {
    %c0_i32 = arith.constant 0 : i32
    %0 = arith.cmpi eq, %arg1, %c0_i32 : i32
    %1 = arith.extui %0 : i1 to i32
    %c0_i32_0 = arith.constant 0 : i32
    %2 = arith.cmpi ne, %1, %c0_i32_0 : i32
    scf.if %2 {
      %cst_10 = arith.constant 0.000000e+00 : f32
      %12 = vector.broadcast %cst_10 : f32 to vector<16x32xf32>
      %c0_11 = arith.constant 0 : index
      %c0_12 = arith.constant 0 : index
      %13 = vector.load %arg9[%c0_11, %c0_12] : memref<16x32xf32, #tpu.memory_space<vmem>>, vector<16x32xf32>
      tpu.vector_store %arg9[%c0_11, %c0_12], %12 {strides = array<i32>} : memref<16x32xf32, #tpu.memory_space<vmem>>, vector<16x32xf32>,
    } else {
    }
    %c0 = arith.constant 0 : index
    %c0_1 = arith.constant 0 : index
    %3 = vector.load %arg9[%c0, %c0_1] : memref<16x32xf32, #tpu.memory_space<vmem>>, vector<16x32xf32>
    %c0_2 = arith.constant 0 : index
    %c0_3 = arith.constant 0 : index
    %4 = vector.load %arg2[%c0_2, %c0_3] : memref<16x64xbf16, #tpu.memory_space<vmem>>, vector<16x64xbf16>
    %c0_4 = arith.constant 0 : index
    %c0_5 = arith.constant 0 : index
    %5 = vector.load %arg3[%c0_4, %c0_5] : memref<64x32xbf16, #tpu.memory_space<vmem>>, vector<64x32xbf16>
    %cst = arith.constant dense<0.000000e+00> : vector<16x32xf32>
    %6 = tpu.matmul %4, %5, %cst {dimension_numbers = #tpu.dot_dimension_numbers<[1], [0], [0], [1], [0, 0, 1, 1], [], []>} : vector<16x64xbf16>, vector<64x32xbf16>, vector<16x32xf32> -> vector<16x32xf32>
    %7 = arith.addf %3, %6 : vector<16x32xf32>
    %c0_6 = arith.constant 0 : index
    %c0_7 = arith.constant 0 : index
    %8 = vector.load %arg9[%c0_6, %c0_7] : memref<16x32xf32, #tpu.memory_space<vmem>>, vector<16x32xf32>
    tpu.vector_store %arg9[%c0_6, %c0_7], %7 {strides = array<i32>} : memref<16x32xf32, #tpu.memory_space<vmem>>, vector<16x32xf32>,
    %c0_i32_8 = arith.constant 0 : i32
    %9 = arith.cmpi eq, %arg1, %c0_i32_8 : i32
    %10 = arith.extui %9 : i1 to i32
    %c0_i32_9 = arith.constant 0 : i32
    %11 = arith.cmpi ne, %10, %c0_i32_9 : i32
    scf.if %11 {
      %c0_10 = arith.constant 0 : index
      %c0_11 = arith.constant 0 : index
      %12 = vector.load %arg9[%c0_10, %c0_11] : memref<16x32xf32, #tpu.memory_space<vmem>>, vector<16x32xf32>
      %c0_12 = arith.constant 0 : index
      %c0_13 = arith.constant 0 : index
      %13 = vector.load %arg4[%c0_12, %c0_13] : memref<1x32xf32, #tpu.memory_space<vmem>>, vector<1x32xf32>
      %14 = vector.broadcast %13 : vector<1x32xf32> to vector<16x32xf32>
      %15 = arith.addf %12, %14 : vector<16x32xf32>
      %c0_14 = arith.constant 0 : index
      %c0_15 = arith.constant 0 : index
      %16 = vector.load %arg5[%c0_14, %c0_15] : memref<16x32xbf16, #tpu.memory_space<vmem>>, vector<16x32xbf16>
      %17 = arith.extf %16 : vector<16x32xbf16> to vector<16x32xf32>
      %18 = arith.addf %15, %17 : vector<16x32xf32>
      %cst_16 = arith.constant dense<0.000000e+00> : vector<16xf32>
      %19 = vector.multi_reduction <add>, %18, %cst_16 [1] : vector<16x32xf32> to vector<16xf32>
      %20 = vector.shape_cast %19 : vector<16xf32> to vector<16x1xf32>
      %cst_17 = arith.constant 3.200000e+01 : f32
      %21 = vector.broadcast %cst_17 : f32 to vector<16x1xf32>
      %22 = arith.divf %20, %21 : vector<16x1xf32>
      %23 = vector.broadcast %22 : vector<16x1xf32> to vector<16x32xf32>
      %24 = arith.subf %18, %23 : vector<16x32xf32>
      %25 = arith.mulf %24, %24 : vector<16x32xf32>
      %cst_18 = arith.constant dense<0.000000e+00> : vector<16xf32>
      %26 = vector.multi_reduction <add>, %25, %cst_18 [1] : vector<16x32xf32> to vector<16xf32>
      %27 = vector.shape_cast %26 : vector<16xf32> to vector<16x1xf32>
      %cst_19 = arith.constant 3.200000e+01 : f32
      %28 = vector.broadcast %cst_19 : f32 to vector<16x1xf32>
      %29 = arith.divf %27, %28 : vector<16x1xf32>
      %30 = vector.broadcast %22 : vector<16x1xf32> to vector<16x32xf32>
      %31 = arith.subf %18, %30 : vector<16x32xf32>
      %cst_20 = arith.constant 9.99999996E-13 : f32
      %32 = vector.broadcast %cst_20 : f32 to vector<16x1xf32>
      %33 = arith.addf %29, %32 : vector<16x1xf32>
      %34 = math.rsqrt %33 : vector<16x1xf32>
      %35 = vector.broadcast %34 : vector<16x1xf32> to vector<16x32xf32>
      %36 = arith.mulf %31, %35 : vector<16x32xf32>
      %c0_21 = arith.constant 0 : index
      %c0_22 = arith.constant 0 : index
      %37 = vector.load %arg6[%c0_21, %c0_22] : memref<1x32xf32, #tpu.memory_space<vmem>>, vector<1x32xf32>
      %38 = vector.broadcast %37 : vector<1x32xf32> to vector<16x32xf32>
      %39 = arith.mulf %36, %38 : vector<16x32xf32>
      %c0_23 = arith.constant 0 : index
      %c0_24 = arith.constant 0 : index
      %40 = vector.load %arg7[%c0_23, %c0_24] : memref<1x32xf32, #tpu.memory_space<vmem>>, vector<1x32xf32>
      %41 = vector.broadcast %40 : vector<1x32xf32> to vector<16x32xf32>
      %42 = arith.addf %39, %41 : vector<16x32xf32>
      %43 = arith.truncf %42 : vector<16x32xf32> to vector<16x32xbf16>
      %c0_25 = arith.constant 0 : index
      %c0_26 = arith.constant 0 : index
      %44 = vector.load %arg8[%c0_25, %c0_26] : memref<16x32xbf16, #tpu.memory_space<vmem>>, vector<16x32xbf16>
      tpu.vector_store %arg8[%c0_25, %c0_26], %43 {strides = array<i32>} : memref<16x32xbf16, #tpu.memory_space<vmem>>, vector<16x32xbf16>,
    } else {
    }
    return
  }
  func.func @transform_0(%arg0: i32, %arg1: i32) -> (i32, i32) {
    %c0_i32 = arith.constant 0 : i32
    return %arg0, %arg1 : i32, i32
  }
  func.func @transform_1(%arg0: i32, %arg1: i32) -> (i32, i32) {
    %c0_i32 = arith.constant 0 : i32
    %c0_i32_0 = arith.constant 0 : i32
    return %arg1, %c0_i32 : i32, i32
  }
  func.func @transform_2(%arg0: i32, %arg1: i32) -> (i32, i32) {
    %c0_i32 = arith.constant 0 : i32
    %c0_i32_0 = arith.constant 0 : i32
    %c0_i32_1 = arith.constant 0 : i32
    return %c0_i32, %c0_i32_0 : i32, i32
  }
  func.func @transform_3(%arg0: i32, %arg1: i32) -> (i32, i32) {
    %c0_i32 = arith.constant 0 : i32
    %c0_i32_0 = arith.constant 0 : i32
    return %arg0, %c0_i32 : i32, i32
  }
  func.func @transform_4(%arg0: i32, %arg1: i32) -> (i32, i32) {
    %c0_i32 = arith.constant 0 : i32
    %c0_i32_0 = arith.constant 0 : i32
    %c0_i32_1 = arith.constant 0 : i32
    return %c0_i32, %c0_i32_0 : i32, i32
  }
  func.func @transform_5(%arg0: i32, %arg1: i32) -> (i32, i32) {
    %c0_i32 = arith.constant 0 : i32
    %c0_i32_0 = arith.constant 0 : i32
    %c0_i32_1 = arith.constant 0 : i32
    return %c0_i32, %c0_i32_0 : i32, i32
  }
  func.func @transform_6(%arg0: i32, %arg1: i32) -> (i32, i32) {
    %c0_i32 = arith.constant 0 : i32
    %c0_i32_0 = arith.constant 0 : i32
    return %arg0, %c0_i32 : i32, i32
  }
}

</mosaic_0001>

<bundles_post_ra>
// kernel: punctuation_model_forward.12
= control target key start
LH: loop header
LB: loop body
LE: loop exit
PB: predicated region body
PF: predicated region fallthrough
CT: control target
= control target key end

     0   :  { %vm16_vm0 = vcmask 261120   ;;  %vm70_vm1 = vcmask 257024   ;;  %s129_s0 = inlined_call_operand.vmem [shape: f32[16,32], index: 0, kind: input, shape index: {}]   ;;  %s130_s1 = inlined_call_operand.vmem [shape: f32[1,32], index: 1, kind: input, shape index: {}]   ;;  %s131_s2 = inlined_call_operand.vmem [shape: f32[1,32], index: 2, kind: input, shape index: {}]   ;;  %s132_s3 = inlined_call_operand.vmem [shape: bf16[16,32], index: 3, kind: output, shape index: {}]  }
   0x1   :  { %v14_v0 = vld [vmem:[%s129_s0] sm:$0xff]  ;;  %v15_v1 = vld [vmem:[%s129_s0 + $0x8] sm:$0xff] }
   0x2   :  { %v17_v2 = vsel %vm16_vm0, %v14_v0, 0.0  ;;  %v20_v3 = vsel %vm16_vm0, %v15_v1, 0.0  ;;  %v77_v21 = vld [vmem:[%s130_s1] ss:$0 sm:$0xff] }
   0x3   :  { %18 = vadd.xlane.f32.xlu0 %v17_v2  ;;  %v78_v23 = vld [vmem:[%s131_s2] ss:$0 sm:$0xff] }
   0x7   :  { %21 = vadd.xlane.f32.xlu0 %v20_v3 }
  0x8c   :  { %v19_v4 = vpop.xlane.xlu0 %18 }
  0x8d   :  { %v24_v5 = vmul.f32 0.03125, %v19_v4 }
  0x8f   :  { %v26_v6 = vsub.f32 %v14_v0, %v24_v5 }
  0x90   :  { %v22_v7 = vpop.xlane.xlu0 %21 }
  0x91   :  { %v25_v8 = vmul.f32 0.03125, %v22_v7  ;;  %v28_v9 = vmul.f32 %v26_v6, %v26_v6 }
  0x93   :  { %v27_v10 = vsub.f32 %v15_v1, %v25_v8  ;;  %v30_v11 = vsel %vm16_vm0, %v28_v9, 0.0 }
  0x94   :  { %31 = vadd.xlane.f32.xlu1 %v30_v11 }
  0x95   :  { %v29_v12 = vmul.f32 %v27_v10, %v27_v10 }
  0x97   :  { %v33_v13 = vsel %vm16_vm0, %v29_v12, 0.0 }
  0x98   :  { %34 = vadd.xlane.f32.xlu1 %v33_v13 }
 0x11d   :  { %v32_v14 = vpop.xlane.xlu1 %31 }
 0x11e   :  { %v36_v15 = vmul.f32 0.03125, %v32_v14 }
 0x120   :  { %v38_v16 = vadd.f32 1e-12, %v36_v15 }
 0x121   :  { %v35_v17 = vpop.xlane.xlu1 %34 }
 0x122   :  { %83 = vrsqrt.f32 %v38_v16  ;;  %v37_v18 = vmul.f32 0.03125, %v35_v17 }
 0x124   :  { %v39_v19 = vadd.f32 1e-12, %v37_v18 }
 0x126   :  { %85 = vrsqrt.f32 %v39_v19 }
 0x12f   :  { %v84_v20 = vpop.eup %83 }
 0x130   :  { %v42_v22 = vmul.f32 %v84_v20, %v26_v6 }
 0x132   :  { %v51_v24 = vmul.f32 %v77_v21, %v42_v22 }
 0x133   :  { %v86_v25 = vpop.eup %85 }
 0x134   :  { %v60_v26 = vadd.f32 %v78_v23, %v51_v24  ;;  %v43_v27 = vmul.f32 %v86_v25, %v27_v10 }
 0x136   :  { %v81_v28 = vpack.c.bf16 %v60_v26, %v60_v26  ;;  %v52_v29 = vmul.f32 %v77_v21, %v43_v27 }
 0x138   :  { %71 = vst.msk [vmem:[%s132_s3] sm:$0xf] %vm70_vm1, %v81_v28  ;;  %v61_v30 = vadd.f32 %v78_v23, %v52_v29 }
 0x13a   :  { %v82_v31 = vpack.c.bf16 %v61_v30, %v61_v30 }
 0x13c   :  { %72 = vst.msk [vmem:[%s132_s3 + $0x4] sm:$0xf] %vm70_vm1, %v82_v31 }

// kernel: punctuation_model_forward.15
= control target key start
LH: loop header
LB: loop body
LE: loop exit
PB: predicated region body
PF: predicated region fallthrough
CT: control target
= control target key end

     0   :  { %s637_s21 = smov 0   ;;  %s639_s22 = smov 0   ;;  %s698_s0 = inlined_call_operand.vmem [shape: bf16[2,1,8,32], index: 0, kind: input, shape index: {}]   ;;  %s699_s1 = inlined_call_operand.vmem [shape: bf16[1,32,32], index: 1, kind: input, shape index: {}]   ;;  %s700_s2 = inlined_call_operand.vmem [shape: f32[1,32], index: 2, kind: input, shape index: {}]   ;;  %s701_s3 = inlined_call_operand.vmem [shape: bf16[16,32], index: 3, kind: input, shape index: {}]   ;;  %s702_s4 = inlined_call_operand.vmem [shape: f32[1,32], index: 4, kind: input, shape index: {}]   ;;  %s703_s5 = inlined_call_operand.vmem [shape: f32[1,32], index: 5, kind: input, shape index: {}]   ;;  %s704_s6 = inlined_call_operand.vmem [shape: bf16[16,32], index: 6, kind: output, shape index: {}]  }
   0x1   :  { %s641_s23 = smov 0  }
   0x2 LB: > { %s28_s24 = sadd.s32 1, %s594_s22  ;;  %p523_p0 = scmp.ge.s32.totalorder %s598_s23, 1  ;;  %s598_s23 = sphi %s641_s23, %s16_s23   ;;  %s594_s22 = sphi %s639_s22, %s706_s22   ;;  %s590_s21 = sphi %s637_s21, %s705_s21  }
   0x3   : > { %p30_p1 = scmp.ge.s32.totalorder %s28_s24, 2  ;;  %p247_p2 = scmp.lt.s32.totalorder %s598_s23, 3 }
   0x5   : > { %s708_s24 = smov (%p30_p1, %s28_s24), 0  ;;  %p248_p3 = pnand %p523_p0, %p247_p2 }
   0x6   : > { %p287_p4 = scmp.lt.s32.totalorder (!%p248_p3), %s590_s21, 1 }
   0x7   : > { %251 = sbr.rel (%p248_p3) target bundleno = 539 (0x21b), region = 44 }
   0xc   : > { %v572_v0 = vld [vmem:[%s699_s1 + $0x8] sm:$0xff]   ;;  %v600_v1 = vmov 0.0   ;;  %v573_v2 = vld [vmem:[%s699_s1] sm:$0xff]   ;;  %vm601_vm0 = vmmov 0   ;;  %vm312_vm1 = vcmask 261120   ;;  %s710_s21 = smov (!%p287_p4, %s590_s21), 1 }
   0xd   : > { %538 = vmatprep.subr.bf16.mxu0 %v600_v1  ;;  %542 = vmatprep.mubr.msk.bf16.mxu0 %vm601_vm0, %v600_v1  ;;  %313 = vst.msk [vmem:[#allocation2] sm:$0xff] %vm312_vm1, %v600_v1  ;;  %s662_s29 = sshll.u32 %s710_s21, 2  ;;  %v530_v11 = vld [vmem:[%s700_s2] ss:$0 sm:$0xff]  ;;  %vm424_vm2 = vcmask 257024  }
   0xe   : > { %539 = vmatpush3.bf16.msra.mxu0 %v572_v0  ;;  %s293_s8 = scalar_lea.vmem %s698_s0, %s662_s29  ;;  %s302_s11 = scalar_lea.vmem %s701_s3, %s662_s29  ;;  %v531_v26 = vld [vmem:[%s702_s4] ss:$0 sm:$0xff] }
   0xf   : > { %540 = vmatprep.subr.bf16.mxu0 %v600_v1  ;;  %v315_v3 = vld [vmem:[%s293_s8] sm:$0xf]  ;;  %s306_s20 = scalar_lea.vmem %s704_s6, %s662_s29 }
  0x10   : > { %v390_v10 = vld [vmem:[%s302_s11] sm:$0xf] }
  0x11   : > { %v391_v12 = vunpack.c.l.bf16 %v390_v10  ;;  %v532_v28 = vld [vmem:[%s703_s5] ss:$0 sm:$0xff] }
  0x12   : > { %541 = vmatpush3.bf16.msra.mxu0 %v573_v2 }
  0x14   : > { %v314_v4 = vld [vmem:[#allocation2] sm:$0xff] }
  0x15   : > { %543 = vmatmul.mubr.msk.bf16.vlgmr.msra.gmra.mxu0 %vm312_vm1, %v315_v3 }
  0xd5   : > { %v370_v5 = vpop.f32.mrf.mxu0 }
  0xd6   : > { %v376_v6 = vadd.f32 %v370_v5, %v314_v4 }
  0xd7   : > { %v544_v7 = vpop.f32.mrf.mxu0 }
  0xd8   : > { %377 = vst.msk [vmem:[#allocation2] sm:$0xff] %vm312_vm1, %v376_v6 }
  0xd9   : > { %v373_v8 = vpop.f32.mrf.mxu0 }
  0xdb   : > { %v545_v9 = vpop.f32.mrf.mxu0 }
  0xdf   : > { %v381_v13 = vld [vmem:[#allocation2] sm:$0xff] }
  0xe0   : > { %v389_v14 = vadd.f32 %v530_v11, %v381_v13 }
  0xe2   : > { %v392_v15 = vadd.f32 %v391_v12, %v389_v14 }
  0xe4   : > { %v393_v16 = vsel %vm312_vm1, %v392_v15, 0.0 }
  0xe5   : > { %394 = vadd.xlane.f32.xlu0 %v393_v16 }
 0x16e   : > { %v395_v17 = vpop.xlane.xlu0 %394 }
 0x16f   : > { %v397_v18 = vmul.f32 0.03125, %v395_v17 }
 0x171   : > { %v398_v19 = vsub.f32 %v392_v15, %v397_v18 }
 0x173   : > { %v399_v20 = vmul.f32 %v398_v19, %v398_v19 }
 0x175   : > { %v400_v21 = vsel %vm312_vm1, %v399_v20, 0.0 }
 0x176   : > { %401 = vadd.xlane.f32.xlu0 %v400_v21 }
 0x1ff   : > { %v402_v22 = vpop.xlane.xlu0 %401 }
 0x200   : > { %v403_v23 = vmul.f32 0.03125, %v402_v22 }
 0x202   : > { %v404_v24 = vadd.f32 1e-12, %v403_v23 }
 0x204   : > { %574 = vrsqrt.f32 %v404_v24 }
 0x211   : > { %v575_v25 = vpop.eup %574 }
 0x212   : > { %v406_v27 = vmul.f32 %v575_v25, %v398_v19 }
 0x214   : > { %v414_v29 = vmul.f32 %v531_v26, %v406_v27 }
 0x216   : > { %v422_v30 = vadd.f32 %v532_v28, %v414_v29 }
 0x218   : > { %v423_v31 = vpack.c.bf16 %v422_v30, %v422_v30 }
 0x21a   : > { %425 = vst.msk [vmem:[%s306_s20] sm:$0xf] %vm424_vm2, %v423_v31 }
 0x21b PF: > { %s16_s23 = sadd.s32 1, %s598_s23   ;;  %s705_s21 = smov %s594_s22 }
 0x21c   : > { %p13_p5 = scmp.ge.s32.totalorder %s16_s23, 4   ;;  %s706_s22 = smov %s708_s24 }
 0x21e   :  { %15 = sbr.rel (!%p13_p5) target bundleno = 2 (0x2), region = 88 }

// kernel: punctuation_model_forward.14
= control target key start
LH: loop header
LB: loop body
LE: loop exit
PB: predicated region body
PF: predicated region fallthrough
CT: control target
= control target key end

     0   :  { %s736_s12 = smov 0   ;;  %s738_s13 = smov 0   ;;  %s798_s0 = inlined_call_operand.vmem [shape: bf16[2,1,8,32], index: 0, kind: input, shape index: {}]   ;;  %s799_s1 = inlined_call_operand.vmem [shape: bf16[2,1,8,32], index: 1, kind: input, shape index: {}]   ;;  %s800_s2 = inlined_call_operand.vmem [shape: bf16[2,1,8,32], index: 2, kind: input, shape index: {}]   ;;  %s801_s3 = inlined_call_operand.vmem [shape: bf16[2,1,8,32], index: 3, kind: output, shape index: {}]  }
   0x1   :  { %s740_s14 = smov 0  }
   0x2 LB: > { %s25_s15 = sadd.s32 1, %s706_s13  ;;  %p603_p0 = scmp.ge.s32.totalorder %s710_s14, 1  ;;  %s710_s14 = sphi %s740_s14, %s13_s14   ;;  %s706_s13 = sphi %s738_s13, %s803_s13   ;;  %s702_s12 = sphi %s736_s12, %s802_s12  }
   0x3   : > { %p27_p1 = scmp.ge.s32.totalorder %s25_s15, 2  ;;  %p183_p2 = scmp.lt.s32.totalorder %s710_s14, 3 }
   0x5   : > { %s805_s15 = smov (%p27_p1, %s25_s15), 0  ;;  %p184_p3 = pnand %p603_p0, %p183_p2 }
   0x6   : > { %p225_p4 = scmp.lt.s32.totalorder (!%p184_p3), %s702_s12, 1  ;;  %s714_s23 = smov (!%p184_p3), 112  }
   0x7   : > { %187 = sbr.rel (%p184_p3) target bundleno = 1052 (0x41c), region = 32  ;;  %s715_s27 = smov (!%p184_p3), 16  }
   0xc   : > { %v712_v0 = vmov 0.0   ;;  %vm713_vm0 = vmmov 0   ;;  %s807_s12 = smov (!%p225_p4, %s702_s12), 1  ;;  %vm257_vm1 = vcmask 130048   ;;  %vm304_vm2 = vcmask 64512  }
   0xd   : > { %625 = vmatprep.subr.bf16.mxu0 %v712_v0  ;;  %627 = vmatprep.mubr.msk.bf16.mxu0 %vm713_vm0, %v712_v0  ;;  %s756_s16 = sshll.u32 %s807_s12, 2  ;;  %vm320_vm3 = vcmask 1043456   ;;  %vm493_vm4 = vcmask 257024  }
   0xe   : > { %631 = vmatprep.subr.bf16.mxu1 %v712_v0  ;;  %633 = vmatprep.mubr.msk.bf16.mxu1 %vm713_vm0, %v712_v0  ;;  %s238_s19 = scalar_lea.vmem %s799_s1, %s756_s16  ;;  %s231_s22 = scalar_lea.vmem %s798_s0, %s756_s16 }
   0xf   : > { %v255_v1 = vld [vmem:[%s238_s19] sm:$0xf]  ;;  %s245_s26 = scalar_lea.vmem %s800_s2, %s756_s16  ;;  %s252_s30 = scalar_lea.vmem %s801_s3, %s756_s16 }
  0x10   : > { %v262_v2 = vsel %vm257_vm1, %v255_v1, 0  ;;  %v254_v3 = vld [vmem:[%s231_s22] sm:$0xf]  ;;  %v611_v11 = vcombine.low %v255_v1, %v255_v1 }
  0x11   : > { %626 = vmatpush3.bf16.xpose.msra.mxu0 %v262_v2  ;;  %v610_v4 = vcombine.low %v254_v3, %v254_v3  ;;  %v256_v10 = vld [vmem:[%s245_s26] sm:$0xf] }
  0x12   : > { %643 = vmatprep.subr.bf16.mxu0 %v712_v0  ;;  %v322_v12 = vsel %vm320_vm3, %v256_v10, 0  ;;  %v613_v13 = vcombine.low %v256_v10, %v256_v10 }
  0x13   : > { %369 = vrot.lane.b32.xlu1 %v610_v4, %s714_s23  ;;  %632 = vmatpush3.bf16.msra.mxu1 %v322_v12 }
  0x14   : > { %637 = vmatprep.subr.bf16.mxu1 %v712_v0 }
  0x18   : > { %628 = vmatmul.mubr.msk.bf16.vlgmr.msra.gmra.mxu0 %vm257_vm1, %v254_v3 }
  0x19   : > { %645 = vmatprep.mubr.msk.bf16.mxu0 %vm713_vm0, %v712_v0 }
  0x85   : > { %v370_v21 = vpop.permute.xlu1 %369 }
  0xd8   : > { %v298_v5 = vpop.f32.mrf.mxu0 }
  0xd9   : > { %v305_v6 = vsel %vm304_vm2, %v298_v5, -inf }
  0xda   : > { %306 = vmax.xlane.f32.xlu0 %v305_v6  ;;  %v629_v7 = vpop.f32.mrf.mxu0 }
  0xdc   : > { %v301_v8 = vpop.f32.mrf.mxu0 }
  0xde   : > { %v630_v9 = vpop.f32.mrf.mxu0 }
  0xf0   : > { %374 = vrot.lane.b32.xlu0 %v611_v11, %s714_s23 }
  0xf4   : > { %437 = vrot.lane.b32.xlu0 %v613_v13, %s714_s23 }
 0x163   : > { %v307_v14 = vpop.xlane.xlu0 %306 }
 0x164   : > { %v308_v15 = vsub.f32 %v298_v5, %v307_v14 }
 0x166   : > { %v309_v16 = vpack.c.bf16 %v308_v15, %v308_v15 }
 0x167   : > { %v375_v18 = vpop.permute.xlu0 %374 }
 0x168   : > { %v311_v17 = vmul.bf16 1069105081, %v309_v16  ;;  %v380_v19 = vsel %vm257_vm1, %v375_v18, 0 }
 0x16a   : > { %680 = vpow.bf16 %v311_v17 }
 0x16b   : > { %v438_v33 = vpop.permute.xlu0 %437 }
 0x16c   : > { %v443_v34 = vsel %vm320_vm3, %v438_v33, 0 }
 0x16d   : > { %644 = vmatpush3.bf16.msra.mxu0 %v443_v34 }
 0x178   : > { %v681_v20 = vpop.eup %680 }
 0x179   : > { %634 = vmatmul.mubr.msk.bf16.vlgmr.msra.gmra.mxu1 %vm304_vm2, %v681_v20  ;;  %v313_v28 = vunpack.c.l.bf16 %v681_v20 }
 0x17a   : > { %638 = vmatpush3.bf16.xpose.msra.mxu1 %v380_v19  ;;  %639 = vmatprep.mubr.msk.bf16.mxu1 %vm713_vm0, %v712_v0 }
 0x17b   : > { %v314_v31 = vsel %vm304_vm2, %v313_v28, 0.0 }
 0x181   : > { %640 = vmatmul.mubr.msk.bf16.vlgmr.msra.gmra.mxu1 %vm257_vm1, %v370_v21 }
 0x239   : > { %v358_v22 = vpop.f32.mrf.mxu1 }
 0x23b   : > { %v635_v23 = vpop.f32.mrf.mxu1 }
 0x23d   : > { %v361_v24 = vpop.f32.mrf.mxu1 }
 0x23f   : > { %v636_v25 = vpop.f32.mrf.mxu1 }
 0x241   : > { %v416_v26 = vpop.f32.mrf.mxu1 }
 0x242   : > { %v422_v27 = vsel %vm304_vm2, %v416_v26, -inf }
 0x243   : > { %423 = vmax.xlane.f32.xlu1 %v422_v27  ;;  %v641_v29 = vpop.f32.mrf.mxu1 }
 0x245   : > { %v419_v30 = vpop.f32.mrf.mxu1 }
 0x247   : > { %315 = vadd.xlane.f32.xlu1 %v314_v31  ;;  %v642_v32 = vpop.f32.mrf.mxu1 }
 0x2cc   : > { %v424_v35 = vpop.xlane.xlu1 %423 }
 0x2cd   : > { %v425_v36 = vsub.f32 %v416_v26, %v424_v35 }
 0x2cf   : > { %v426_v37 = vpack.c.bf16 %v425_v36, %v425_v36 }
 0x2d0   : > { %v316_v49 = vpop.xlane.xlu1 %315 }
 0x2d1   : > { %v428_v38 = vmul.bf16 1069105081, %v426_v37 }
 0x2d3   : > { %682 = vpow.bf16 %v428_v38 }
 0x2e1   : > { %v683_v39 = vpop.eup %682 }
 0x2e2   : > { %646 = vmatmul.mubr.msk.bf16.vlgmr.msra.gmra.mxu0 %vm304_vm2, %v683_v39  ;;  %v430_v40 = vunpack.c.l.bf16 %v683_v39 }
 0x2e4   : > { %v431_v41 = vsel %vm304_vm2, %v430_v40, 0.0 }
 0x2e5   : > { %432 = vadd.xlane.f32.xlu0 %v431_v41 }
 0x36e   : > { %v433_v42 = vpop.xlane.xlu0 %432 }
 0x36f   : > { %684 = vrcp.f32 %v433_v42 }
 0x370   : > { %686 = vrcp.f32 %v316_v49 }
 0x37c   : > { %v685_v43 = vpop.eup %684 }
 0x37d   : > { %v687_v50 = vpop.eup %686 }
 0x37e   : > { %v365_v51 = vmul.f32 %v687_v50, %v358_v22 }
 0x3a2   : > { %v479_v44 = vpop.f32.mrf.mxu0 }
 0x3a3   : > { %v486_v45 = vmul.f32 %v685_v43, %v479_v44 }
 0x3a4   : > { %v647_v46 = vpop.f32.mrf.mxu0 }
 0x3a5   : > { %488 = vrot.lane.b32.xlu1 %v486_v45, %s715_s27 }
 0x3a6   : > { %v482_v47 = vpop.f32.mrf.mxu0 }
 0x3a8   : > { %v648_v48 = vpop.f32.mrf.mxu0 }
 0x417   : > { %v489_v52 = vpop.permute.xlu1 %488 }
 0x418   : > { %v491_v53 = vsel %vm257_vm1, %v365_v51, %v489_v52 }
 0x419   : > { %v492_v54 = vpack.c.bf16 %v491_v53, %v491_v53 }
 0x41b   : > { %494 = vst.msk [vmem:[%s252_s30] sm:$0xf] %vm493_vm4, %v492_v54 }
 0x41c PF: > { %s13_s14 = sadd.s32 1, %s710_s14   ;;  %s802_s12 = smov %s706_s13 }
 0x41d   : > { %p10_p5 = scmp.ge.s32.totalorder %s13_s14, 4   ;;  %s803_s13 = smov %s805_s15 }
 0x41f   :  { %12 = sbr.rel (!%p10_p5) target bundleno = 2 (0x2), region = 68 }

// kernel: punctuation_model_forward.13
= control target key start
LH: loop header
LB: loop body
LE: loop exit
PB: predicated region body
PF: predicated region fallthrough
CT: control target
= control target key end

     0   :  { %s1095_s30 = smov 0   ;;  %s1097_s10 = smov 0   ;;  %s1173_s0 = inlined_call_operand.vmem [shape: bf16[16,32], index: 0, kind: input, shape index: {}]   ;;  %s1174_s1 = inlined_call_operand.vmem [shape: bf16[1,32,32], index: 1, kind: input, shape index: {}]   ;;  %s1175_s2 = inlined_call_operand.vmem [shape: bf16[1,32,32], index: 2, kind: input, shape index: {}]   ;;  %s1176_s3 = inlined_call_operand.vmem [shape: bf16[1,32,32], index: 3, kind: input, shape index: {}]   ;;  %s1177_s4 = inlined_call_operand.vmem [shape: f32[1,1,32], index: 4, kind: input, shape index: {}]   ;;  %s1178_s5 = inlined_call_operand.vmem [shape: f32[1,1,32], index: 5, kind: input, shape index: {}]   ;;  %s1179_s6 = inlined_call_operand.vmem [shape: f32[1,1,32], index: 6, kind: input, shape index: {}]   ;;  %s1180_s7 = inlined_call_operand.vmem [shape: bf16[2,1,8,32], index: 7, kind: output, shape index: {0}]   ;;  %s1181_s8 = inlined_call_operand.vmem [shape: bf16[2,1,8,32], index: 8, kind: output, shape index: {1}]   ;;  %s1182_s9 = inlined_call_operand.vmem [shape: bf16[2,1,8,32], index: 9, kind: output, shape index: {2}]  }
   0x1   :  { %s1099_s11 = smov 0  }
   0x2 LB: > { %s29_s12 = sadd.s32 1, %s1037_s10  ;;  %p935_p0 = scmp.ge.s32.totalorder %s1041_s11, 1  ;;  %s1041_s11 = sphi %s1099_s11, %s20_s11   ;;  %s1037_s10 = sphi %s1097_s10, %s1184_s10   ;;  %s1033_s30 = sphi %s1095_s30, %s1183_s30  }
   0x3   : > { %p30_p1 = scmp.ge.s32.totalorder %s29_s12, 2  ;;  %p363_p2 = scmp.lt.s32.totalorder %s1041_s11, 3 }
   0x5   : > { %s1186_s12 = smov (%p30_p1, %s29_s12), 0  ;;  %p364_p3 = pnand %p935_p0, %p363_p2 }
   0x6   : > { %p438_p4 = scmp.lt.s32.totalorder (!%p364_p3), %s1033_s30, 1 }
   0x7   : > { %367 = sbr.rel (%p364_p3) target bundleno = 228 (0xe4), region = 48 }
   0xc   : > { %v1013_v0 = vld [vmem:[%s1174_s1 + $0x8] sm:$0xff]   ;;  %v1043_v1 = vmov 0.0   ;;  %v1015_v3 = vld [vmem:[%s1174_s1] sm:$0xff]   ;;  %vm1044_vm0 = vmmov 0   ;;  %s1188_s30 = smov (!%p438_p4, %s1033_s30), 1  ;;  %vm512_vm1 = vcmask 261120  }
   0xd   : > { %963 = vmatprep.subr.bf16.mxu0 %v1043_v1  ;;  %971 = vmatprep.subr.bf16.mxu1 %v1043_v1  ;;  %v1014_v2 = vld [vmem:[%s1175_s2 + $0x8] sm:$0xff]   ;;  %v1016_v4 = vld [vmem:[%s1175_s2] sm:$0xff]   ;;  %s1127_s21 = sshll.u32 %s1188_s30, 2  ;;  %vm558_vm2 = vcmask 257024  }
   0xe   : > { %964 = vmatpush3.bf16.msra.mxu0 %v1013_v0  ;;  %967 = vmatprep.mubr.msk.bf16.mxu0 %vm1044_vm0, %v1043_v1  ;;  %v1017_v5 = vld [vmem:[%s1176_s3 + $0x8] sm:$0xff]   ;;  %s441_s26 = scalar_lea.vmem %s1173_s0, %s1127_s21  ;;  %v1018_v7 = vld [vmem:[%s1176_s3] sm:$0xff]   ;;  %s479_s17 = scalar_lea.vmem %s1181_s8, %s1127_s21 }
   0xf   : > { %965 = vmatprep.subr.bf16.mxu0 %v1043_v1  ;;  %972 = vmatpush3.bf16.msra.mxu1 %v1014_v2  ;;  %v488_v6 = vld [vmem:[%s441_s26] sm:$0xf]  ;;  %s472_s20 = scalar_lea.vmem %s1180_s7, %s1127_s21  ;;  %s486_s26 = scalar_lea.vmem %s1182_s9, %s1127_s21 }
  0x10   : > { %973 = vmatprep.subr.bf16.mxu1 %v1043_v1  ;;  %975 = vmatprep.mubr.msk.bf16.mxu1 %vm1044_vm0, %v1043_v1  ;;  %v940_v8 = vld [vmem:[%s1177_s4] ss:$0 sm:$0xff] }
  0x11   : > { %v944_v9 = vld [vmem:[%s1178_s5] ss:$0 sm:$0xff] }
  0x12   : > { %966 = vmatpush3.bf16.msra.mxu0 %v1015_v3  ;;  %v948_v22 = vld [vmem:[%s1179_s6] ss:$0 sm:$0xff] }
  0x13   : > { %974 = vmatpush3.bf16.msra.mxu1 %v1016_v4  ;;  %979 = vmatprep.subr.bf16.mxu0 %v1043_v1 }
  0x15   : > { %968 = vmatmul.mubr.msk.bf16.vlgmr.msra.gmra.mxu0 %vm512_vm1, %v488_v6 }
  0x16   : > { %980 = vmatpush3.bf16.msra.mxu0 %v1017_v5  ;;  %976 = vmatmul.mubr.msk.bf16.vlgmr.msra.gmra.mxu1 %vm512_vm1, %v488_v6 }
  0x17   : > { %981 = vmatprep.subr.bf16.mxu0 %v1043_v1  ;;  %983 = vmatprep.mubr.msk.bf16.mxu0 %vm1044_vm0, %v1043_v1 }
  0x1a   : > { %982 = vmatpush3.bf16.msra.mxu0 %v1018_v7 }
  0x1d   : > { %984 = vmatmul.mubr.msk.bf16.vlgmr.msra.gmra.mxu0 %vm512_vm1, %v488_v6 }
  0xd5   : > { %v550_v10 = vpop.f32.mrf.mxu0 }
  0xd6   : > { %v551_v11 = vadd.f32 %v940_v8, %v550_v10  ;;  %v617_v12 = vpop.f32.mrf.mxu1 }
  0xd7   : > { %v969_v13 = vpop.f32.mrf.mxu0  ;;  %v618_v14 = vadd.f32 %v944_v9, %v617_v12 }
  0xd8   : > { %v556_v15 = vmul.f32 0.25, %v551_v11  ;;  %v977_v16 = vpop.f32.mrf.mxu1 }
  0xd9   : > { %v623_v17 = vpack.c.bf16 %v618_v14, %v618_v14  ;;  %v553_v18 = vpop.f32.mrf.mxu0 }
  0xda   : > { %v557_v19 = vpack.c.bf16 %v556_v15, %v556_v15  ;;  %v620_v20 = vpop.f32.mrf.mxu1 }
  0xdb   : > { %624 = vst.msk [vmem:[%s479_s17] sm:$0xf] %vm558_vm2, %v623_v17  ;;  %v970_v21 = vpop.f32.mrf.mxu0 }
  0xdc   : > { %559 = vst.msk [vmem:[%s472_s20] sm:$0xf] %vm558_vm2, %v557_v19  ;;  %v978_v23 = vpop.f32.mrf.mxu1 }
  0xdd   : > { %v682_v24 = vpop.f32.mrf.mxu0 }
  0xde   : > { %v683_v25 = vadd.f32 %v948_v22, %v682_v24 }
  0xdf   : > { %v985_v26 = vpop.f32.mrf.mxu0 }
  0xe0   : > { %v688_v27 = vpack.c.bf16 %v683_v25, %v683_v25 }
  0xe1   : > { %v685_v28 = vpop.f32.mrf.mxu0 }
  0xe2   : > { %689 = vst.msk [vmem:[%s486_s26] sm:$0xf] %vm558_vm2, %v688_v27 }
  0xe3   : > { %v986_v29 = vpop.f32.mrf.mxu0 }
  0xe4 PF: > { %s20_s11 = sadd.s32 1, %s1041_s11   ;;  %s1183_s30 = smov %s1037_s10 }
  0xe5   : > { %p17_p5 = scmp.ge.s32.totalorder %s20_s11, 4   ;;  %s1184_s10 = smov %s1186_s12 }
  0xe7   :  { %19 = sbr.rel (!%p17_p5) target bundleno = 2 (0x2), region = 120 }

// kernel: punctuation_model_forward.23
= control target key start
LH: loop header
LB: loop body
LE: loop exit
PB: predicated region body
PF: predicated region fallthrough
CT: control target
= control target key end

     0   :  { %v136_v0 = vmov 0.0   ;;  %vm137_vm0 = vmmov 0   ;;  %vm46_vm1 = vcmask 261120   ;;  %s176_s1 = inlined_call_operand.vmem [shape: bf16[32,128], index: 1, kind: input, shape index: {}]   ;;  %s177_s0 = inlined_call_operand.vmem [shape: bf16[16,32], index: 0, kind: input, shape index: {}]   ;;  %s178_s2 = inlined_call_operand.vmem [shape: f32[1,128], index: 2, kind: input, shape index: {}]   ;;  %s179_s3 = inlined_call_operand.vmem [shape: f32[16,128], index: 3, kind: output, shape index: {}]  }
   0x1   :  { %123 = vmatprep.subr.bf16.mxu0 %v136_v0  ;;  %v133_v1 = vld [vmem:[%s176_s1 + $0x8] sm:$0xff]   ;;  %127 = vmatprep.mubr.msk.bf16.mxu0 %vm137_vm0, %v136_v0  ;;  %v134_v2 = vld [vmem:[%s176_s1] sm:$0xff]  }
   0x2   :  { %124 = vmatpush3.bf16.msra.mxu0 %v133_v1  ;;  %v135_v3 = vld [vmem:[%s177_s0] sm:$0xff]  }
   0x3   :  { %125 = vmatprep.subr.bf16.mxu0 %v136_v0  ;;  %v119_v4 = vld [vmem:[%s178_s2] ss:$0 sm:$0xff] }
   0x6   :  { %126 = vmatpush3.bf16.msra.mxu0 %v134_v2 }
   0x9   :  { %128 = vmatmul.mubr.msk.bf16.vlgmr.msra.gmra.mxu0 %vm46_vm1, %v135_v3 }
  0xc9   :  { %v84_v5 = vpop.f32.mrf.mxu0 }
  0xca   :  { %v107_v6 = vadd.f32 %v119_v4, %v84_v5 }
  0xcb   :  { %v129_v7 = vpop.f32.mrf.mxu0 }
  0xcc   :  { %109 = vst [vmem:[%s179_s3] sm:$0xff] %v107_v6 }
  0xcd   :  { %v87_v8 = vpop.f32.mrf.mxu0 }
  0xce   :  { %v108_v9 = vadd.f32 %v119_v4, %v87_v8 }
  0xcf   :  { %v130_v10 = vpop.f32.mrf.mxu0 }
  0xd0   :  { %110 = vst [vmem:[%s179_s3 + $0x8] sm:$0xff] %v108_v9 }

// kernel: punctuation_model_forward.16
= control target key start
LH: loop header
LB: loop body
LE: loop exit
PB: predicated region body
PF: predicated region fallthrough
CT: control target
= control target key end

     0   :  { %vm19_vm0 = vcmask 523264   ;;  %v173_v0 = vmov 0.0   ;;  %vm174_vm1 = vmmov 0   ;;  %vm47_vm2 = vcmask 261120   ;;  %s217_s1 = inlined_call_operand.vmem [shape: bf16[32,64], index: 1, kind: input, shape index: {}]   ;;  %s218_s0 = inlined_call_operand.vmem [shape: bf16[16,32], index: 0, kind: input, shape index: {}]   ;;  %s219_s2 = inlined_call_operand.vmem [shape: f32[1,64], index: 2, kind: input, shape index: {}]   ;;  %s220_s3 = inlined_call_operand.vmem [shape: bf16[16,64], index: 3, kind: output, shape index: {}]  }
   0x1   :  { %156 = vmatprep.subr.bf16.mxu0 %v173_v0  ;;  %v166_v1 = vld [vmem:[%s217_s1 + $0x8] sm:$0xff]   ;;  %160 = vmatprep.mubr.msk.bf16.mxu0 %vm174_vm1, %v173_v0  ;;  %20 = vst.msk [vmem:[#allocation2] sm:$0xff] %vm19_vm0, %v173_v0  ;;  %21 = vst.msk [vmem:[#allocation2 + $0x8] sm:$0xff] %vm19_vm0, %v173_v0  ;;  %v167_v2 = vld [vmem:[%s217_s1] sm:$0xff]   ;;  %vm137_vm3 = vcmask 519168  }
   0x2   :  { %157 = vmatpush3.bf16.msra.mxu0 %v166_v1  ;;  %v168_v3 = vld [vmem:[%s218_s0] sm:$0xff]  }
   0x3   :  { %158 = vmatprep.subr.bf16.mxu0 %v173_v0  ;;  %v148_v12 = vld [vmem:[%s219_s2] ss:$0 sm:$0xff] }
   0x6   :  { %159 = vmatpush3.bf16.msra.mxu0 %v167_v2 }
   0x8   :  { %v22_v4 = vld [vmem:[#allocation2] sm:$0xff]  ;;  %v23_v8 = vld [vmem:[#allocation2 + $0x8] sm:$0xff] }
   0x9   :  { %161 = vmatmul.mubr.msk.bf16.vlgmr.msra.gmra.mxu0 %vm47_vm2, %v168_v3 }
  0xc9   :  { %v85_v5 = vpop.f32.mrf.mxu0 }
  0xca   :  { %v92_v6 = vadd.f32 %v85_v5, %v22_v4 }
  0xcb   :  { %v162_v7 = vpop.f32.mrf.mxu0 }
  0xcc   :  { %95 = vst.msk [vmem:[#allocation2] sm:$0xff] %vm19_vm0, %v92_v6 }
  0xcd   :  { %v88_v9 = vpop.f32.mrf.mxu0 }
  0xce   :  { %v93_v10 = vadd.f32 %v88_v9, %v23_v8 }
  0xcf   :  { %v163_v11 = vpop.f32.mrf.mxu0 }
  0xd0   :  { %96 = vst.msk [vmem:[#allocation2 + $0x8] sm:$0xff] %vm19_vm0, %v93_v10 }
  0xd3   :  { %v100_v13 = vld [vmem:[#allocation2] sm:$0xff] }
  0xd4   :  { %v109_v14 = vadd.f32 %v148_v12, %v100_v13 }
  0xd6   :  { %v111_v15 = vmul.f32 %v109_v14, %v109_v14 }
  0xd7   :  { %v101_v16 = vld [vmem:[#allocation2 + $0x8] sm:$0xff] }
  0xd8   :  { %v113_v17 = vmul.f32 %v111_v15, %v109_v14  ;;  %v110_v18 = vadd.f32 %v148_v12, %v101_v16 }
  0xda   :  { %v115_v19 = vmul.f32 0.044715, %v113_v17  ;;  %v112_v20 = vmul.f32 %v110_v18, %v110_v18 }
  0xdc   :  { %v117_v21 = vadd.f32 %v115_v19, %v109_v14  ;;  %v114_v22 = vmul.f32 %v112_v20, %v110_v18 }
  0xde   :  { %v119_v23 = vmul.f32 0.7978846, %v117_v21  ;;  %v116_v24 = vmul.f32 0.044715, %v114_v22 }
  0xe0   :  { %169 = vtanh.f32 %v119_v23  ;;  %v118_v25 = vadd.f32 %v116_v24, %v110_v18 }
  0xe2   :  { %v120_v26 = vmul.f32 0.7978846, %v118_v25 }
  0xe4   :  { %171 = vtanh.f32 %v120_v26 }
  0xed   :  { %v170_v27 = vpop.eup %169 }
  0xee   :  { %v123_v28 = vadd.f32 1.0, %v170_v27 }
  0xf0   :  { %v125_v29 = vmul.f32 0.5, %v123_v28 }
  0xf1   :  { %v172_v30 = vpop.eup %171 }
  0xf2   :  { %v127_v31 = vmul.f32 %v125_v29, %v109_v14  ;;  %v124_v32 = vadd.f32 1.0, %v172_v30 }
  0xf4   :  { %v151_v33 = vpack.c.bf16 %v127_v31, %v127_v31  ;;  %v126_v34 = vmul.f32 0.5, %v124_v32 }
  0xf6   :  { %138 = vst.msk [vmem:[%s220_s3] sm:$0xf] %vm137_vm3, %v151_v33  ;;  %v128_v35 = vmul.f32 %v126_v34, %v110_v18 }
  0xf8   :  { %v152_v36 = vpack.c.bf16 %v128_v35, %v128_v35 }
  0xfa   :  { %139 = vst.msk [vmem:[%s220_s3 + $0x4] sm:$0xf] %vm137_vm3, %v152_v36 }

// kernel: punctuation_model_forward.17
= control target key start
LH: loop header
LB: loop body
LE: loop exit
PB: predicated region body
PF: predicated region fallthrough
CT: control target
= control target key end

     0   :  { %vm28_vm0 = vcmask 261120   ;;  %v247_v0 = vmov 0.0   ;;  %vm248_vm1 = vmmov 0   ;;  %vm72_vm2 = vcmask 523264   ;;  %s325_s1 = inlined_call_operand.vmem [shape: bf16[64,32], index: 1, kind: input, shape index: {}]   ;;  %s326_s0 = inlined_call_operand.vmem [shape: bf16[16,64], index: 0, kind: input, shape index: {}]   ;;  %s327_s3 = inlined_call_operand.vmem [shape: bf16[16,32], index: 3, kind: input, shape index: {}]   ;;  %s328_s2 = inlined_call_operand.vmem [shape: f32[1,32], index: 2, kind: input, shape index: {}]   ;;  %s329_s4 = inlined_call_operand.vmem [shape: f32[1,32], index: 4, kind: input, shape index: {}]   ;;  %s330_s5 = inlined_call_operand.vmem [shape: f32[1,32], index: 5, kind: input, shape index: {}]   ;;  %s331_s6 = inlined_call_operand.vmem [shape: bf16[16,32], index: 6, kind: output, shape index: {}]  }
   0x1   :  { %224 = vmatprep.subr.bf16.mxu0 %v247_v0  ;;  %v238_v1 = vld [vmem:[%s325_s1 + $0x18] sm:$0xff]   ;;  %232 = vmatprep.mubr.msk.bf16.mxu0 %vm248_vm1, %v247_v0  ;;  %29 = vst.msk [vmem:[#allocation2] sm:$0xff] %vm28_vm0, %v247_v0  ;;  %30 = vst.msk [vmem:[#allocation2 + $0x8] sm:$0xff] %vm28_vm0, %v247_v0  ;;  %v239_v2 = vld [vmem:[%s325_s1 + $0x10] sm:$0xff]   ;;  %vm195_vm3 = vcmask 257024  }
   0x2   :  { %225 = vmatpush3.bf16.msra.mxu0 %v238_v1  ;;  %v240_v3 = vld [vmem:[%s325_s1 + $0x8] sm:$0xff]   ;;  %v241_v4 = vld [vmem:[%s325_s1] sm:$0xff]  }
   0x3   :  { %226 = vmatprep.subr.bf16.mxu0 %v247_v0  ;;  %v242_v5 = vld [vmem:[%s326_s0] sm:$0xff]  }
   0x4   :  { %v216_v14 = vld [vmem:[%s327_s3] sm:$0xff]  }
   0x5   :  { %v208_v15 = vld [vmem:[%s328_s2] ss:$0 sm:$0xff]  ;;  %v217_v16 = vunpack.c.l.bf16 %v216_v14  ;;  %v218_v20 = vunpack.c.h.bf16 %v216_v14 }
   0x6   :  { %227 = vmatpush3.bf16.msra.mxu0 %v239_v2  ;;  %v209_v43 = vld [vmem:[%s329_s4] ss:$0 sm:$0xff] }
   0x7   :  { %228 = vmatprep.subr.bf16.mxu0 %v247_v0  ;;  %v210_v45 = vld [vmem:[%s330_s5] ss:$0 sm:$0xff] }
   0x8   :  { %v31_v6 = vld [vmem:[#allocation2] sm:$0xff]  ;;  %v32_v10 = vld [vmem:[#allocation2 + $0x8] sm:$0xff] }
   0xa   :  { %229 = vmatpush3.bf16.msra.mxu0 %v240_v3 }
   0xb   :  { %230 = vmatprep.subr.bf16.mxu0 %v247_v0 }
   0xe   :  { %231 = vmatpush3.bf16.msra.mxu0 %v241_v4 }
  0x11   :  { %233 = vmatmul.mubr.msk.bf16.vlgmr.msra.gmra.mxu0 %vm72_vm2, %v242_v5 }
  0xd1   :  { %v110_v7 = vpop.f32.mrf.mxu0 }
  0xd2   :  { %v117_v8 = vadd.f32 %v110_v7, %v31_v6 }
  0xd3   :  { %v234_v9 = vpop.f32.mrf.mxu0 }
  0xd4   :  { %120 = vst.msk [vmem:[#allocation2] sm:$0xff] %vm28_vm0, %v117_v8 }
  0xd5   :  { %v113_v11 = vpop.f32.mrf.mxu0 }
  0xd6   :  { %v118_v12 = vadd.f32 %v113_v11, %v32_v10 }
  0xd7   :  { %v235_v13 = vpop.f32.mrf.mxu0 }
  0xd8   :  { %121 = vst.msk [vmem:[#allocation2 + $0x8] sm:$0xff] %vm28_vm0, %v118_v12 }
  0xdb   :  { %v125_v17 = vld [vmem:[#allocation2] sm:$0xff] }
  0xdc   :  { %v134_v18 = vadd.f32 %v208_v15, %v125_v17 }
  0xde   :  { %v140_v19 = vadd.f32 %v217_v16, %v134_v18 }
  0xdf   :  { %v126_v21 = vld [vmem:[#allocation2 + $0x8] sm:$0xff] }
  0xe0   :  { %v142_v22 = vsel %vm28_vm0, %v140_v19, 0.0  ;;  %v135_v23 = vadd.f32 %v208_v15, %v126_v21 }
  0xe1   :  { %143 = vadd.xlane.f32.xlu0 %v142_v22 }
  0xe2   :  { %v141_v24 = vadd.f32 %v218_v20, %v135_v23 }
  0xe4   :  { %v145_v25 = vsel %vm28_vm0, %v141_v24, 0.0 }
  0xe5   :  { %146 = vadd.xlane.f32.xlu0 %v145_v25 }
 0x16a   :  { %v144_v26 = vpop.xlane.xlu0 %143 }
 0x16b   :  { %v149_v27 = vmul.f32 0.03125, %v144_v26 }
 0x16d   :  { %v151_v28 = vsub.f32 %v140_v19, %v149_v27 }
 0x16e   :  { %v147_v29 = vpop.xlane.xlu0 %146 }
 0x16f   :  { %v150_v30 = vmul.f32 0.03125, %v147_v29  ;;  %v153_v31 = vmul.f32 %v151_v28, %v151_v28 }
 0x171   :  { %v152_v32 = vsub.f32 %v141_v24, %v150_v30  ;;  %v155_v33 = vsel %vm28_vm0, %v153_v31, 0.0 }
 0x172   :  { %156 = vadd.xlane.f32.xlu1 %v155_v33 }
 0x173   :  { %v154_v34 = vmul.f32 %v152_v32, %v152_v32 }
 0x175   :  { %v158_v35 = vsel %vm28_vm0, %v154_v34, 0.0 }
 0x176   :  { %159 = vadd.xlane.f32.xlu1 %v158_v35 }
 0x1fb   :  { %v157_v36 = vpop.xlane.xlu1 %156 }
 0x1fc   :  { %v161_v37 = vmul.f32 0.03125, %v157_v36 }
 0x1fe   :  { %v163_v38 = vadd.f32 1e-12, %v161_v37 }
 0x1ff   :  { %v160_v39 = vpop.xlane.xlu1 %159 }
 0x200   :  { %243 = vrsqrt.f32 %v163_v38  ;;  %v162_v40 = vmul.f32 0.03125, %v160_v39 }
 0x202   :  { %v164_v41 = vadd.f32 1e-12, %v162_v40 }
 0x204   :  { %245 = vrsqrt.f32 %v164_v41 }
 0x20d   :  { %v244_v42 = vpop.eup %243 }
 0x20e   :  { %v167_v44 = vmul.f32 %v244_v42, %v151_v28 }
 0x210   :  { %v176_v46 = vmul.f32 %v209_v43, %v167_v44 }
 0x211   :  { %v246_v47 = vpop.eup %245 }
 0x212   :  { %v185_v48 = vadd.f32 %v210_v45, %v176_v46  ;;  %v168_v49 = vmul.f32 %v246_v47, %v152_v32 }
 0x214   :  { %v213_v50 = vpack.c.bf16 %v185_v48, %v185_v48  ;;  %v177_v51 = vmul.f32 %v209_v43, %v168_v49 }
 0x216   :  { %196 = vst.msk [vmem:[%s331_s6] sm:$0xf] %vm195_vm3, %v213_v50  ;;  %v186_v52 = vadd.f32 %v210_v45, %v177_v51 }
 0x218   :  { %v214_v53 = vpack.c.bf16 %v186_v52, %v186_v52 }
 0x21a   :  { %197 = vst.msk [vmem:[%s331_s6 + $0x4] sm:$0xf] %vm195_vm3, %v214_v53 }

</bundles_post_ra>
